<compile_context>
chip_gen: v7x
topology: tpu7x:2x2x1
jax: 0.10.0
libtpu: 0.0.40
codegen_flags: <defaults>
</compile_context>

<pallas_src>
import functools

import jax
import jax.numpy as jnp
from jax.experimental import pallas as pl
from jax.experimental.pallas import tpu as pltpu


BATCH_TILE = 128  # M rows per grid step: keeps the MXU full, x/out tiles pipelined.


def _round_up(n, m):
    return (n + m - 1) // m * m


def mlp_kernel(x_ref, w1_ref, b1_ref, w2_ref, b2_ref, w3_ref, b3_ref, o_ref):
    """One batch tile: out = relu(relu(x@W1+b1)@W2+b2)@W3+b3 (dropouts = identity).

    x: bf16 (BATCH_TILE, IN_pad); weights: bf16 (in_pad, out_pad); biases: f32 (1, out_pad).
    All matmuls accumulate in f32 on the MXU; intermediates re-cast to bf16.
    """
    x = x_ref[...]

    h1 = jnp.dot(x, w1_ref[...], preferred_element_type=jnp.float32) + b1_ref[...]
    h1 = jnp.maximum(h1, 0.0).astype(jnp.bfloat16)

    h2 = jnp.dot(h1, w2_ref[...], preferred_element_type=jnp.float32) + b2_ref[...]
    h2 = jnp.maximum(h2, 0.0).astype(jnp.bfloat16)

    out = jnp.dot(h2, w3_ref[...], preferred_element_type=jnp.float32) + b3_ref[...]
    o_ref[...] = out.astype(o_ref.dtype)


def prepare_params(w1, b1, w2, b2, w3, b3):
    """One-time model-load prep (NOT in the per-call hot path).

    PyTorch Linear stores weight as (out, in); transpose to (in, out), zero-pad all
    feature dims to multiples of 128, cast weights to bf16 (biases stay f32).
    """
    def pad2(a, rows, cols):
        return jnp.pad(a, ((0, rows - a.shape[0]), (0, cols - a.shape[1])))

    in_p = _round_up(w1.shape[1], 128)
    h1_p = _round_up(w1.shape[0], 128)
    h2_p = _round_up(w2.shape[0], 128)
    out_p = _round_up(w3.shape[0], 128)

    w1t = pad2(w1.T, in_p, h1_p).astype(jnp.bfloat16)
    w2t = pad2(w2.T, h1_p, h2_p).astype(jnp.bfloat16)
    w3t = pad2(w3.T, h2_p, out_p).astype(jnp.bfloat16)
    b1r = jnp.pad(b1.astype(jnp.float32), (0, h1_p - b1.shape[0]))[None, :]
    b2r = jnp.pad(b2.astype(jnp.float32), (0, h2_p - b2.shape[0]))[None, :]
    b3r = jnp.pad(b3.astype(jnp.float32), (0, out_p - b3.shape[0]))[None, :]
    return (w1t, b1r, w2t, b2r, w3t, b3r)


@functools.partial(jax.jit, static_argnames=("out_size",))
def mlp_forward(x, params, out_size):
    """x: (B, input_size) f32. params: output of prepare_params. Returns (B, out_size) f32."""
    w1t, b1r, w2t, b2r, w3t, b3r = params
    B, in_features = x.shape
    in_p = w1t.shape[0]
    out_p = w3t.shape[1]

    # Pad batch to a multiple of the batch tile and features to the padded K dim.
    b_pad = _round_up(max(B, BATCH_TILE), BATCH_TILE)
    xp = jnp.pad(x, ((0, b_pad - B), (0, in_p - in_features))).astype(jnp.bfloat16)

    # Weights/biases: constant block index across the batch grid -> VMEM-resident.
    resident = lambda a: pl.BlockSpec(a.shape, lambda i: (0, 0))

    out = pl.pallas_call(
        mlp_kernel,
        out_shape=jax.ShapeDtypeStruct((b_pad, out_p), jnp.float32),
        grid=(b_pad // BATCH_TILE,),
        in_specs=[
            pl.BlockSpec((BATCH_TILE, in_p), lambda i: (i, 0)),
            resident(w1t), resident(b1r),
            resident(w2t), resident(b2r),
            resident(w3t), resident(b3r),
        ],
        out_specs=pl.BlockSpec((BATCH_TILE, out_p), lambda i: (i, 0)),
        compiler_params=pltpu.CompilerParams(
            dimension_semantics=("parallel",),  # shard batch tiles across TCs on v7x
        ),
    )(xp, w1t, b1r, w2t, b2r, w3t, b3r)

    return out[:B, :out_size]


def init_linear(key, in_features, out_features):
    """Deterministic PyTorch-style init: U(-1/sqrt(in), 1/sqrt(in))."""
    kw, kb = jax.random.split(key)
    bound = 1.0 / jnp.sqrt(jnp.float32(in_features))
    w = jax.random.uniform(kw, (out_features, in_features), jnp.float32, -bound, bound)
    b = jax.random.uniform(kb, (out_features,), jnp.float32, -bound, bound)
    return w, b


def ref_forward_bf16(x, w1, b1, w2, b2, w3, b3):
    """Pure-JAX reference with the same bf16 weight/activation quantization."""
    xb = x.astype(jnp.bfloat16)
    w1b = w1.T.astype(jnp.bfloat16)
    w2b = w2.T.astype(jnp.bfloat16)
    w3b = w3.T.astype(jnp.bfloat16)
    h = jnp.maximum(jnp.dot(xb, w1b, preferred_element_type=jnp.float32) + b1, 0.0)
    h = h.astype(jnp.bfloat16)
    h = jnp.maximum(jnp.dot(h, w2b, preferred_element_type=jnp.float32) + b2, 0.0)
    h = h.astype(jnp.bfloat16)
    return jnp.dot(h, w3b, preferred_element_type=jnp.float32) + b3


if __name__ == "__main__":
    # MNIST-like shapes: batch=8, input_size=784 (28*28), output_size=10.
    input_size, output_size = 784, 10
    batch = 8

    key = jax.random.PRNGKey(0)
    kx, k1, k2, k3 = jax.random.split(key, 4)

    x = jax.random.normal(kx, (batch, input_size), jnp.float32)
    w1, b1 = init_linear(k1, input_size, 300)
    w2, b2 = init_linear(k2, 300, 200)
    w3, b3 = init_linear(k3, 200, output_size)

    # One-time weight prep (model-load time), kept out of the per-call path.
    params = prepare_params(w1, b1, w2, b2, w3, b3)

    out = mlp_forward(x, params, output_size)
    out = jax.block_until_ready(out)

    ref = ref_forward_bf16(x, w1, b1, w2, b2, w3, b3)
    assert out.shape == (batch, output_size)
    assert jnp.allclose(out, ref, atol=2e-2, rtol=2e-2), (
        float(jnp.max(jnp.abs(out - ref))))

    print("KERNEL_OK")
</pallas_src>

<mosaic_0001>
module attributes {stable_mosaic.version = 11 : i64} {
  func.func @mlp_kernel(%arg0: i32, %arg1: memref<128x896xbf16, #tpu.memory_space<vmem>>, %arg2: memref<896x384xbf16, #tpu.memory_space<vmem>>, %arg3: memref<1x384xf32, #tpu.memory_space<vmem>>, %arg4: memref<384x256xbf16, #tpu.memory_space<vmem>>, %arg5: memref<1x256xf32, #tpu.memory_space<vmem>>, %arg6: memref<256x128xbf16, #tpu.memory_space<vmem>>, %arg7: memref<1x128xf32, #tpu.memory_space<vmem>>, %arg8: memref<128x128xf32, #tpu.memory_space<vmem>>) attributes {dimension_semantics = [#tpu.dimension_semantics<parallel>], iteration_bounds = array<i64: 1>, scalar_prefetch = 0 : i64, scratch_operands = 0 : i64, tpu.core_type = #tpu.core_type<tc>, window_params = [{transform_indices = @transform_0, window_bounds = array<i64: 128, 896>}, {pipeline_mode = #tpu.pipeline_mode<synchronous>, transform_indices = @transform_1, window_bounds = array<i64: 896, 384>}, {pipeline_mode = #tpu.pipeline_mode<synchronous>, transform_indices = @transform_2, window_bounds = array<i64: 1, 384>}, {pipeline_mode = #tpu.pipeline_mode<synchronous>, transform_indices = @transform_3, window_bounds = array<i64: 384, 256>}, {pipeline_mode = #tpu.pipeline_mode<synchronous>, transform_indices = @transform_4, window_bounds = array<i64: 1, 256>}, {pipeline_mode = #tpu.pipeline_mode<synchronous>, transform_indices = @transform_5, window_bounds = array<i64: 256, 128>}, {pipeline_mode = #tpu.pipeline_mode<synchronous>, transform_indices = @transform_6, window_bounds = array<i64: 1, 128>}, {transform_indices = @transform_7, window_bounds = array<i64: 128, 128>}]} {
    %c0 = arith.constant 0 : index
    %c0_0 = arith.constant 0 : index
    %0 = vector.load %arg1[%c0, %c0_0] : memref<128x896xbf16, #tpu.memory_space<vmem>>, vector<128x896xbf16>
    %c0_1 = arith.constant 0 : index
    %c0_2 = arith.constant 0 : index
    %1 = vector.load %arg2[%c0_1, %c0_2] : memref<896x384xbf16, #tpu.memory_space<vmem>>, vector<896x384xbf16>
    %cst = arith.constant dense<0.000000e+00> : vector<128x384xf32>
    %2 = tpu.matmul %0, %1, %cst {dimension_numbers = #tpu.dot_dimension_numbers<[1], [0], [0], [1], [0, 0, 1, 1], [], []>} : vector<128x896xbf16>, vector<896x384xbf16>, vector<128x384xf32> -> vector<128x384xf32>
    %c0_3 = arith.constant 0 : index
    %c0_4 = arith.constant 0 : index
    %3 = vector.load %arg3[%c0_3, %c0_4] : memref<1x384xf32, #tpu.memory_space<vmem>>, vector<1x384xf32>
    %4 = vector.broadcast %3 : vector<1x384xf32> to vector<128x384xf32>
    %5 = arith.addf %2, %4 : vector<128x384xf32>
    %cst_5 = arith.constant 0.000000e+00 : f32
    %6 = vector.broadcast %cst_5 : f32 to vector<128x384xf32>
    %7 = arith.maximumf %5, %6 : vector<128x384xf32>
    %8 = arith.truncf %7 : vector<128x384xf32> to vector<128x384xbf16>
    %c0_6 = arith.constant 0 : index
    %c0_7 = arith.constant 0 : index
    %9 = vector.load %arg4[%c0_6, %c0_7] : memref<384x256xbf16, #tpu.memory_space<vmem>>, vector<384x256xbf16>
    %cst_8 = arith.constant dense<0.000000e+00> : vector<128x256xf32>
    %10 = tpu.matmul %8, %9, %cst_8 {dimension_numbers = #tpu.dot_dimension_numbers<[1], [0], [0], [1], [0, 0, 1, 1], [], []>} : vector<128x384xbf16>, vector<384x256xbf16>, vector<128x256xf32> -> vector<128x256xf32>
    %c0_9 = arith.constant 0 : index
    %c0_10 = arith.constant 0 : index
    %11 = vector.load %arg5[%c0_9, %c0_10] : memref<1x256xf32, #tpu.memory_space<vmem>>, vector<1x256xf32>
    %12 = vector.broadcast %11 : vector<1x256xf32> to vector<128x256xf32>
    %13 = arith.addf %10, %12 : vector<128x256xf32>
    %cst_11 = arith.constant 0.000000e+00 : f32
    %14 = vector.broadcast %cst_11 : f32 to vector<128x256xf32>
    %15 = arith.maximumf %13, %14 : vector<128x256xf32>
    %16 = arith.truncf %15 : vector<128x256xf32> to vector<128x256xbf16>
    %c0_12 = arith.constant 0 : index
    %c0_13 = arith.constant 0 : index
    %17 = vector.load %arg6[%c0_12, %c0_13] : memref<256x128xbf16, #tpu.memory_space<vmem>>, vector<256x128xbf16>
    %cst_14 = arith.constant dense<0.000000e+00> : vector<128x128xf32>
    %18 = tpu.matmul %16, %17, %cst_14 {dimension_numbers = #tpu.dot_dimension_numbers<[1], [0], [0], [1], [0, 0, 1, 1], [], []>} : vector<128x256xbf16>, vector<256x128xbf16>, vector<128x128xf32> -> vector<128x128xf32>
    %c0_15 = arith.constant 0 : index
    %c0_16 = arith.constant 0 : index
    %19 = vector.load %arg7[%c0_15, %c0_16] : memref<1x128xf32, #tpu.memory_space<vmem>>, vector<1x128xf32>
    %20 = vector.broadcast %19 : vector<1x128xf32> to vector<128x128xf32>
    %21 = arith.addf %18, %20 : vector<128x128xf32>
    %c0_17 = arith.constant 0 : index
    %c0_18 = arith.constant 0 : index
    %22 = vector.load %arg8[%c0_17, %c0_18] : memref<128x128xf32, #tpu.memory_space<vmem>>, vector<128x128xf32>
    tpu.vector_store %arg8[%c0_17, %c0_18], %21 {strides = array<i32>} : memref<128x128xf32, #tpu.memory_space<vmem>>, vector<128x128xf32>,
    return
  }
  func.func @transform_0(%arg0: i32) -> (i32, i32) {
    %c0_i32 = arith.constant 0 : i32
    %c0_i32_0 = arith.constant 0 : i32
    return %arg0, %c0_i32 : i32, i32
  }
  func.func @transform_1(%arg0: i32) -> (i32, i32) {
    %c0_i32 = arith.constant 0 : i32
    %c0_i32_0 = arith.constant 0 : i32
    %c0_i32_1 = arith.constant 0 : i32
    return %c0_i32, %c0_i32_0 : i32, i32
  }
  func.func @transform_2(%arg0: i32) -> (i32, i32) {
    %c0_i32 = arith.constant 0 : i32
    %c0_i32_0 = arith.constant 0 : i32
    %c0_i32_1 = arith.constant 0 : i32
    return %c0_i32, %c0_i32_0 : i32, i32
  }
  func.func @transform_3(%arg0: i32) -> (i32, i32) {
    %c0_i32 = arith.constant 0 : i32
    %c0_i32_0 = arith.constant 0 : i32
    %c0_i32_1 = arith.constant 0 : i32
    return %c0_i32, %c0_i32_0 : i32, i32
  }
  func.func @transform_4(%arg0: i32) -> (i32, i32) {
    %c0_i32 = arith.constant 0 : i32
    %c0_i32_0 = arith.constant 0 : i32
    %c0_i32_1 = arith.constant 0 : i32
    return %c0_i32, %c0_i32_0 : i32, i32
  }
  func.func @transform_5(%arg0: i32) -> (i32, i32) {
    %c0_i32 = arith.constant 0 : i32
    %c0_i32_0 = arith.constant 0 : i32
    %c0_i32_1 = arith.constant 0 : i32
    return %c0_i32, %c0_i32_0 : i32, i32
  }
  func.func @transform_6(%arg0: i32) -> (i32, i32) {
    %c0_i32 = arith.constant 0 : i32
    %c0_i32_0 = arith.constant 0 : i32
    %c0_i32_1 = arith.constant 0 : i32
    return %c0_i32, %c0_i32_0 : i32, i32
  }
  func.func @transform_7(%arg0: i32) -> (i32, i32) {
    %c0_i32 = arith.constant 0 : i32
    %c0_i32_0 = arith.constant 0 : i32
    return %arg0, %c0_i32 : i32, i32
  }
}

</mosaic_0001>

<bundles_post_ra>
// kernel: mlp_forward.1
= control target key start
LH: loop header
LB: loop body
LE: loop exit
PB: predicated region body
PF: predicated region fallthrough
CT: control target
= control target key end

     0   :  { %12 = vsyncpa [#allocation3], 0  ;;  %s4474_s24 = smov [#allocation2]   ;;  %s5380_s0 = inlined_call_operand.vmem [shape: bf16[128,896], index: 0, kind: input, shape index: {}]   ;;  %s5381_s1 = inlined_call_operand.hbm [shape: bf16[896,384], index: 1, kind: input, shape index: {}]   ;;  %s5382_s2 = inlined_call_operand.vmem [shape: f32[1,384], index: 2, kind: input, shape index: {}]   ;;  %s5383_s3 = inlined_call_operand.vmem [shape: bf16[384,256], index: 3, kind: input, shape index: {}]   ;;  %s5384_s4 = inlined_call_operand.vmem [shape: f32[1,256], index: 4, kind: input, shape index: {}]   ;;  %s5385_s5 = inlined_call_operand.vmem [shape: bf16[256,128], index: 5, kind: input, shape index: {}]   ;;  %s5386_s6 = inlined_call_operand.vmem [shape: f32[1,128], index: 6, kind: input, shape index: {}]   ;;  %s5387_s7 = inlined_call_operand.vmem [shape: f32[128,128], index: 7, kind: output, shape index: {}]  }
   0x1   :  { %s20_s25 = sshll.u32 %s4474_s24, 4  ;;  %s4450_s28 = scalar_lea.hbm %s5381_s1, 21504  ;;  %s21_s25 = int_to_ptr.vmem [resolvable:$true] %s20_s25 }
   0x2   :  { %p4451_p0 = scmp.ne.s32.totalorder %s5381_s1, %s4450_s28  ;;  %p4454_p1 = scmp.lt.u32.totalorder %s4450_s28, %s5381_s1 }
   0x4   :  { %p4456_p2 = pnand %p4454_p1, %p4451_p0 }
   0x6   :  { %4459 = shalt.err (!%p4456_p2)
}
   0x7   :  { %s4460_s10 = scalar_lea.vmem %s21_s25, 21504  ;;  %p4465_p4 = scmp.lt.s32.totalorder %s21_s25, %s21_s25 }
   0x8   :  { %p4461_p3 = scmp.ne.s32.totalorder %s21_s25, %s4460_s10  ;;  %p4466_p5 = scmp.lt.s32.totalorder %s4460_s10, %s4460_s10 }
   0xa   :  { %p4467_p6 = por %p4466_p5, %p4465_p4 }
   0xc   :  { %p4468_p7 = pnand %p4467_p6, %p4461_p3 }
   0xe   :  { %4471 = shalt.err (!%p4468_p7)
}
   0xf   :  { %s4475_s11 = smov 192   ;;  %s4476_s12 = smov 12  }
  0x10   :  { %26 = dma.hbm_to_vmem [thread:$0]  %s5381_s1, 21504, %s21_s25, [#allocation3], %s4475_s11, %s4475_s11, %s4476_s12  }
  0x11   :  { %4472 = dma.done.wait [#allocation3], 21504  }
  0x12   :  { %4473 = vsyncadd [#allocation3], 4294945792  ;;  %v4058_v0 = vld [vmem:[#allocation2 + $0x4] ss:$12 sps:$4 sm:$0xff]   ;;  %v4060_v1 = vld [vmem:[#allocation2 + $0xc8] ss:$12 sps:$4 sm:$0xff]  }
  0x13   :  { %1530 = vmatprep.subr.bf16.mxu0 %v4058_v0  ;;  %v4061_v2 = vld [vmem:[#allocation2] ss:$12 sps:$4 sm:$0xff]   ;;  %3558 = vmatprep.subr.bf16.mxu1 %v4060_v1  ;;  %v4062_v3 = vld [vmem:[#allocation2 + $0x8] ss:$12 sps:$4 sm:$0xff]   ;;  %v4066_v6 = vld [vmem:[#allocation2 + $0x18] ss:$12 sps:$4 sm:$0xff]  }
  0x14   :  { %1531 = vmatpush1.bf16.msra.mxu0 %v4061_v2  ;;  %v4063_v4 = vld [vmem:[#allocation2 + $0x1c] ss:$12 sps:$4 sm:$0xff]   ;;  %3559 = vmatpush3.bf16.msra.mxu1 %v4062_v3  ;;  %v4065_v5 = vld [vmem:[#allocation2 + $0xe0] ss:$12 sps:$4 sm:$0xff]   ;;  %v4070_v9 = vld [vmem:[#allocation2 + $0xf8] ss:$12 sps:$4 sm:$0xff]  }
  0x15   :  { %1532 = vmatprep.subr.bf16.mxu0 %v4063_v4  ;;  %v4067_v7 = vld [vmem:[#allocation2 + $0x20] ss:$12 sps:$4 sm:$0xff]   ;;  %3560 = vmatprep.subr.bf16.mxu1 %v4065_v5  ;;  %v4071_v10 = vld [vmem:[#allocation2 + $0x30] ss:$12 sps:$4 sm:$0xff]   ;;  %v4072_v11 = vld [vmem:[#allocation2 + $0x38] ss:$12 sps:$4 sm:$0xff]  }
  0x16   :  { %v4068_v8 = vld [vmem:[#allocation2 + $0x34] ss:$12 sps:$4 sm:$0xff]   ;;  %v4073_v12 = vld [vmem:[#allocation2 + $0x4c] ss:$12 sps:$4 sm:$0xff]   ;;  %v4075_v13 = vld [vmem:[#allocation2 + $0x110] ss:$12 sps:$4 sm:$0xff]  }
  0x17   :  { %v4076_v14 = vld [vmem:[#allocation2 + $0x48] ss:$12 sps:$4 sm:$0xff]   ;;  %v4077_v15 = vld [vmem:[#allocation2 + $0x50] ss:$12 sps:$4 sm:$0xff]   ;;  %v4081_v18 = vld [vmem:[#allocation2 + $0x60] ss:$12 sps:$4 sm:$0xff]  }
  0x18   :  { %1533 = vmatpush1.bf16.msra.mxu0 %v4066_v6  ;;  %3561 = vmatpush3.bf16.msra.mxu1 %v4067_v7  ;;  %v4078_v16 = vld [vmem:[#allocation2 + $0x64] ss:$12 sps:$4 sm:$0xff]   ;;  %v4080_v17 = vld [vmem:[#allocation2 + $0x128] ss:$12 sps:$4 sm:$0xff]   ;;  %v4085_v21 = vld [vmem:[#allocation2 + $0x140] ss:$12 sps:$4 sm:$0xff]  }
  0x19   :  { %1534 = vmatprep.subr.bf16.mxu0 %v4068_v8  ;;  %3562 = vmatprep.subr.bf16.mxu1 %v4070_v9  ;;  %v4082_v19 = vld [vmem:[#allocation2 + $0x68] ss:$12 sps:$4 sm:$0xff]   ;;  %v4086_v22 = vld [vmem:[#allocation2 + $0x78] ss:$12 sps:$4 sm:$0xff]   ;;  %v4087_v23 = vld [vmem:[#allocation2 + $0x80] ss:$12 sps:$4 sm:$0xff]  }
  0x1a   :  { %v4083_v20 = vld [vmem:[#allocation2 + $0x7c] ss:$12 sps:$4 sm:$0xff]   ;;  %v4088_v24 = vld [vmem:[#allocation2 + $0x94] ss:$12 sps:$4 sm:$0xff]   ;;  %v4090_v25 = vld [vmem:[#allocation2 + $0x158] ss:$12 sps:$4 sm:$0xff]  }
  0x1b   :  { %v4091_v26 = vld [vmem:[#allocation2 + $0x90] ss:$12 sps:$4 sm:$0xff]   ;;  %v4092_v27 = vld [vmem:[#allocation2 + $0x98] ss:$12 sps:$4 sm:$0xff]   ;;  %v4096_v30 = vld [vmem:[#allocation2 + $0xa8] ss:$12 sps:$4 sm:$0xff]  }
  0x1c   :  { %1535 = vmatpush1.bf16.msra.mxu0 %v4071_v10  ;;  %3563 = vmatpush3.bf16.msra.mxu1 %v4072_v11  ;;  %v4093_v28 = vld [vmem:[#allocation2 + $0xac] ss:$12 sps:$4 sm:$0xff]   ;;  %v4095_v29 = vld [vmem:[#allocation2 + $0x170] ss:$12 sps:$4 sm:$0xff]   ;;  %v4100_v31 = vld [vmem:[%s5380_s0 + $0x4] ss:$28 sps:$4 sm:$0xff]  }
  0x1d   :  { %1536 = vmatprep.subr.bf16.mxu0 %v4073_v12  ;;  %3564 = vmatprep.subr.bf16.mxu1 %v4075_v13  ;;  %v4097_v32 = vld [vmem:[#allocation2 + $0xb0] ss:$12 sps:$4 sm:$0xff]   ;;  %v4103_v35 = vld [vmem:[#allocation2 + $0xc0] ss:$12 sps:$4 sm:$0xff]   ;;  %v4106_v38 = vld [vmem:[#allocation2 + $0xd8] ss:$12 sps:$4 sm:$0xff]  }
  0x1e   :  { %v4101_v33 = vld [vmem:[#allocation2 + $0xc4] ss:$12 sps:$4 sm:$0xff]   ;;  %2014 = vmatprep.mubr.bf16.mxu1 %v4100_v31  ;;  %v4536_v34 = vld [vmem:[%s5380_s0] ss:$28 sps:$4 sm:$0xff]   ;;  %1562 = vmatprep.mubr.bf16.mxu0 %v4100_v31  ;;  %v4548_v40 = vld [vmem:[%s5380_s0 + $0x38] ss:$28 sps:$4 sm:$0xff]  }
  0x1f   :  { %v4104_v36 = vld [vmem:[#allocation2 + $0xdc] ss:$12 sps:$4 sm:$0xff]   ;;  %v4109_v39 = vld [vmem:[#allocation2 + $0xf4] ss:$12 sps:$4 sm:$0xff]   ;;  %v4113_v42 = vld [vmem:[#allocation2 + $0x10c] ss:$12 sps:$4 sm:$0xff]  }
  0x20   :  { %1537 = vmatpush1.bf16.msra.mxu0 %v4076_v14  ;;  %3565 = vmatpush3.bf16.msra.mxu1 %v4077_v15  ;;  %v4541_v37 = vld [vmem:[%s5380_s0 + $0x3c] ss:$28 sps:$4 sm:$0xff]   ;;  %v4553_v43 = vld [vmem:[%s5380_s0 + $0x74] ss:$28 sps:$4 sm:$0xff]   ;;  %v4121_v47 = vld [vmem:[#allocation2 + $0x120] ss:$12 sps:$4 sm:$0xff]  }
  0x21   :  { %1538 = vmatprep.subr.bf16.mxu0 %v4078_v16  ;;  %3566 = vmatprep.subr.bf16.mxu1 %v4080_v17  ;;  %v4112_v41 = vld [vmem:[#allocation2 + $0xf0] ss:$12 sps:$4 sm:$0xff]   ;;  %v4115_v44 = vld [vmem:[#allocation2 + $0x108] ss:$12 sps:$4 sm:$0xff]   ;;  %v4145_v52 = vld [vmem:[#allocation2 + $0x260] ss:$12 sps:$4 sm:$0xff]  }
  0x22   :  { %v4118_v45 = vld [vmem:[#allocation2 + $0x124] ss:$12 sps:$4 sm:$0xff]   ;;  %v4140_v48 = vld [vmem:[#allocation2 + $0x248] ss:$12 sps:$4 sm:$0xff]   ;;  %v4146_v53 = vld [vmem:[#allocation2 + $0x1a0] ss:$12 sps:$4 sm:$0xff]  }
  0x23   :  { %v4560_v46 = vld [vmem:[%s5380_s0 + $0x70] ss:$28 sps:$4 sm:$0xff]   ;;  %v4141_v49 = vld [vmem:[#allocation2 + $0x188] ss:$12 sps:$4 sm:$0xff]   ;;  %v4124_v54 = vld [vmem:[#allocation2 + $0x138] ss:$12 sps:$4 sm:$0xff]  }
  0x24   :  { %1539 = vmatpush1.bf16.msra.mxu0 %v4081_v18  ;;  %3567 = vmatpush3.bf16.msra.mxu1 %v4082_v19  ;;  %v4122_v50 = vld [vmem:[#allocation2 + $0x13c] ss:$12 sps:$4 sm:$0xff]   ;;  %v4127_v55 = vld [vmem:[#allocation2 + $0x154] ss:$12 sps:$4 sm:$0xff]   ;;  %v4153_v58 = vld [vmem:[#allocation2 + $0x278] ss:$12 sps:$4 sm:$0xff]  }
  0x25   :  { %1540 = vmatprep.subr.bf16.mxu0 %v4083_v20  ;;  %3568 = vmatprep.subr.bf16.mxu1 %v4085_v21  ;;  %v4565_v51 = vld [vmem:[%s5380_s0 + $0xac] ss:$28 sps:$4 sm:$0xff]   ;;  %v4130_v57 = vld [vmem:[#allocation2 + $0x150] ss:$12 sps:$4 sm:$0xff]   ;;  %v4154_v59 = vld [vmem:[#allocation2 + $0x1b8] ss:$12 sps:$4 sm:$0xff]  }
  0x26   :  { %v4572_v56 = vld [vmem:[%s5380_s0 + $0xa8] ss:$28 sps:$4 sm:$0xff]   ;;  %v4131_v60 = vld [vmem:[#allocation2 + $0x16c] ss:$12 sps:$4 sm:$0xff]   ;;  %v4158_v62 = vld [vmem:[#allocation2 + $0x290] ss:$12 sps:$4 sm:$0xff]  }
  0x27   :  { %v4577_v61 = vld [vmem:[%s5380_s0 + $0xe4] ss:$28 sps:$4 sm:$0xff]   ;;  %v4159_v63 = vld [vmem:[#allocation2 + $0x1d0] ss:$12 sps:$4 sm:$0xff]   ;;  %v4133_v0 = vld [vmem:[#allocation2 + $0x168] ss:$12 sps:$4 sm:$0xff]  }
  0x28   :  { %1541 = vmatpush1.bf16.msra.mxu0 %v4086_v22  ;;  %3569 = vmatpush3.bf16.msra.mxu1 %v4087_v23  ;;  %v4138_v1 = vld [vmem:[#allocation2 + $0x184] ss:$12 sps:$4 sm:$0xff]   ;;  %v4136_v2 = vld [vmem:[#allocation2 + $0x180] ss:$12 sps:$4 sm:$0xff]   ;;  %v4166_v4 = vld [vmem:[#allocation2 + $0x2a8] ss:$12 sps:$4 sm:$0xff]  }
  0x29   :  { %1542 = vmatprep.subr.bf16.mxu0 %v4088_v24  ;;  %3570 = vmatprep.subr.bf16.mxu1 %v4090_v25  ;;  %v4584_v3 = vld [vmem:[%s5380_s0 + $0xe0] ss:$28 sps:$4 sm:$0xff]   ;;  %v4167_v5 = vld [vmem:[#allocation2 + $0x1e8] ss:$12 sps:$4 sm:$0xff]   ;;  %v4142_v10 = vld [vmem:[#allocation2 + $0x198] ss:$12 sps:$4 sm:$0xff]  }
  0x2a   :  { %v4144_v6 = vld [vmem:[#allocation2 + $0x19c] ss:$12 sps:$4 sm:$0xff]   ;;  %v4171_v8 = vld [vmem:[#allocation2 + $0x2c0] ss:$12 sps:$4 sm:$0xff]   ;;  %v4598_v13 = vld [vmem:[%s5380_s0 + $0x118] ss:$28 sps:$4 sm:$0xff]  }
  0x2b   :  { %v4589_v7 = vld [vmem:[%s5380_s0 + $0x11c] ss:$28 sps:$4 sm:$0xff]   ;;  %v4172_v9 = vld [vmem:[#allocation2 + $0x200] ss:$12 sps:$4 sm:$0xff]   ;;  %v4603_v17 = vld [vmem:[%s5380_s0 + $0x154] ss:$28 sps:$4 sm:$0xff]  }
  0x2c   :  { %1543 = vmatpush1.bf16.msra.mxu0 %v4091_v26  ;;  %3571 = vmatpush3.bf16.msra.mxu1 %v4092_v27  ;;  %v4151_v11 = vld [vmem:[#allocation2 + $0x1b4] ss:$12 sps:$4 sm:$0xff]   ;;  %v4149_v12 = vld [vmem:[#allocation2 + $0x1b0] ss:$12 sps:$4 sm:$0xff]   ;;  %v4179_v14 = vld [vmem:[#allocation2 + $0x2d8] ss:$12 sps:$4 sm:$0xff]  }
  0x2d   :  { %1544 = vmatprep.subr.bf16.mxu0 %v4093_v28  ;;  %3572 = vmatprep.subr.bf16.mxu1 %v4095_v29  ;;  %v4180_v15 = vld [vmem:[#allocation2 + $0x218] ss:$12 sps:$4 sm:$0xff]   ;;  %v4184_v18 = vld [vmem:[#allocation2 + $0x2f0] ss:$12 sps:$4 sm:$0xff]   ;;  %v4155_v20 = vld [vmem:[#allocation2 + $0x1c8] ss:$12 sps:$4 sm:$0xff]  }
  0x2e   :  { %v4157_v16 = vld [vmem:[#allocation2 + $0x1cc] ss:$12 sps:$4 sm:$0xff]   ;;  %v4185_v19 = vld [vmem:[#allocation2 + $0x230] ss:$12 sps:$4 sm:$0xff]   ;;  %v4177_v27 = vld [vmem:[#allocation2 + $0x214] ss:$12 sps:$4 sm:$0xff]  }
  0x2f   :  { %v4164_v21 = vld [vmem:[#allocation2 + $0x1e4] ss:$12 sps:$4 sm:$0xff]   ;;  %v4162_v22 = vld [vmem:[#allocation2 + $0x1e0] ss:$12 sps:$4 sm:$0xff]   ;;  %v4170_v24 = vld [vmem:[#allocation2 + $0x1fc] ss:$12 sps:$4 sm:$0xff]  }
  0x30   :  { %1545 = vmatpush1.bf16.msra.mxu0 %v4096_v30  ;;  %3573 = vmatpush3.bf16.msra.mxu1 %v4097_v32  ;;  %v4612_v23 = vld [vmem:[%s5380_s0 + $0x150] ss:$28 sps:$4 sm:$0xff]   ;;  %v4168_v26 = vld [vmem:[#allocation2 + $0x1f8] ss:$12 sps:$4 sm:$0xff]   ;;  %v4181_v32 = vld [vmem:[#allocation2 + $0x228] ss:$12 sps:$4 sm:$0xff]  }
  0x31   :  { %1546 = vmatprep.subr.bf16.mxu0 %v4101_v33  ;;  %3622 = vmatprep.subr.bf16.mxu1 %v4140_v48  ;;  %v4617_v25 = vld [vmem:[%s5380_s0 + $0x18c] ss:$28 sps:$4 sm:$0xff]   ;;  %v4175_v28 = vld [vmem:[#allocation2 + $0x210] ss:$12 sps:$4 sm:$0xff]  }
  0x32   :  { %v4626_v29 = vld [vmem:[%s5380_s0 + $0x188] ss:$28 sps:$4 sm:$0xff]   ;;  %v4183_v30 = vld [vmem:[#allocation2 + $0x22c] ss:$12 sps:$4 sm:$0xff]  }
  0x33   :  { %2015 = vmatmul.mubr.bf16.vlgmr.msra.gmra.mrb[0].mxu1 %v4536_v34  ;;  %v4631_v31 = vld [vmem:[%s5380_s0 + $0xc] ss:$28 sps:$4 sm:$0xff]   ;;  %v4191_v33 = vld [vmem:[#allocation2 + $0x244] ss:$12 sps:$4 sm:$0xff]   ;;  %v4659_v48 = vld [vmem:[%s5380_s0 + $0x7c] ss:$28 sps:$4 sm:$0xff]  }
  0x34   :  { %1547 = vmatpush1.bf16.msra.mxu0 %v4103_v35  ;;  %2022 = vmatprep.mubr.bf16.mxu1 %v4541_v37  ;;  %v4640_v35 = vld [vmem:[%s5380_s0 + $0x8] ss:$28 sps:$4 sm:$0xff]  }
  0x35   :  { %1548 = vmatprep.subr.bf16.mxu0 %v4104_v36  ;;  %3623 = vmatpush3.bf16.msra.mxu1 %v4141_v49  ;;  %v4189_v36 = vld [vmem:[#allocation2 + $0x240] ss:$12 sps:$4 sm:$0xff]   ;;  %v4242_v49 = vld [vmem:[#allocation2 + $0x338] ss:$12 sps:$4 sm:$0xff]  }
  0x36   :  { %3624 = vmatprep.subr.bf16.mxu1 %v4145_v52  ;;  %v4208_v52 = vld [vmem:[#allocation2 + $0x2a4] ss:$12 sps:$4 sm:$0xff]  }
  0x38   :  { %1549 = vmatpush1.bf16.msra.mxu0 %v4106_v38  ;;  %v4645_v38 = vld [vmem:[%s5380_s0 + $0x44] ss:$28 sps:$4 sm:$0xff]  }
  0x39   :  { %1550 = vmatprep.subr.bf16.mxu0 %v4109_v39  ;;  %3625 = vmatpush3.bf16.msra.mxu1 %v4146_v53  ;;  %v4229_v39 = vld [vmem:[#allocation2 + $0x308] ss:$12 sps:$4 sm:$0xff]   ;;  %v4206_v53 = vld [vmem:[#allocation2 + $0x2a0] ss:$12 sps:$4 sm:$0xff]  }
  0x3a   :  { %3626 = vmatprep.subr.bf16.mxu1 %v4153_v58  ;;  %v4673_v58 = vld [vmem:[%s5380_s0 + $0xb4] ss:$28 sps:$4 sm:$0xff]  }
  0x3b   :  { %2023 = vmatmul.mubr.bf16.gmra.mrb[4].mxu1 %v4548_v40 }
  0x3c   :  { %1551 = vmatpush1.bf16.msra.mxu0 %v4112_v41  ;;  %2030 = vmatprep.mubr.bf16.mxu1 %v4553_v43  ;;  %v4192_v41 = vld [vmem:[#allocation2 + $0x258] ss:$12 sps:$4 sm:$0xff]  }
  0x3d   :  { %1552 = vmatprep.subr.bf16.mxu0 %v4113_v42  ;;  %3627 = vmatpush3.bf16.msra.mxu1 %v4154_v59  ;;  %v4199_v42 = vld [vmem:[#allocation2 + $0x274] ss:$12 sps:$4 sm:$0xff]  }
  0x3e   :  { %3628 = vmatprep.subr.bf16.mxu1 %v4158_v62  ;;  %v4255_v59 = vld [vmem:[#allocation2 + $0x368] ss:$12 sps:$4 sm:$0xff]  }
  0x3f   :  { %v4217_v62 = vld [vmem:[#allocation2 + $0x2d4] ss:$12 sps:$4 sm:$0xff]  }
  0x40   :  { %1553 = vmatpush1.bf16.msra.mxu0 %v4115_v44  ;;  %v4234_v44 = vld [vmem:[#allocation2 + $0x320] ss:$12 sps:$4 sm:$0xff]  }
  0x41   :  { %1554 = vmatprep.subr.bf16.mxu0 %v4118_v45  ;;  %3629 = vmatpush3.bf16.msra.mxu1 %v4159_v63  ;;  %v4241_v45 = vld [vmem:[#allocation2 + $0x3f8] ss:$12 sps:$4 sm:$0xff]   ;;  %v4215_v63 = vld [vmem:[#allocation2 + $0x2d0] ss:$12 sps:$4 sm:$0xff]  }
  0x42   :  { %3630 = vmatprep.subr.bf16.mxu1 %v4166_v4  ;;  %v4687_v4 = vld [vmem:[%s5380_s0 + $0xec] ss:$28 sps:$4 sm:$0xff]  }
  0x43   :  { %2031 = vmatmul.mubr.bf16.gmra.mrb[8].mxu1 %v4560_v46 }
  0x44   :  { %1555 = vmatpush1.bf16.msra.mxu0 %v4121_v47  ;;  %2038 = vmatprep.mubr.bf16.mxu1 %v4565_v51  ;;  %v4203_v47 = vld [vmem:[#allocation2 + $0x28c] ss:$12 sps:$4 sm:$0xff]  }
  0x45   :  { %1556 = vmatprep.subr.bf16.mxu0 %v4122_v50  ;;  %3631 = vmatpush3.bf16.msra.mxu1 %v4167_v5  ;;  %v4246_v50 = vld [vmem:[#allocation2 + $0x410] ss:$12 sps:$4 sm:$0xff]   ;;  %v4268_v5 = vld [vmem:[#allocation2 + $0x398] ss:$12 sps:$4 sm:$0xff]  }
  0x46   :  { %3632 = vmatprep.subr.bf16.mxu1 %v4171_v8  ;;  %v4226_v8 = vld [vmem:[#allocation2 + $0x304] ss:$12 sps:$4 sm:$0xff]  }
  0x48   :  { %1557 = vmatpush1.bf16.msra.mxu0 %v4124_v54  ;;  %v4247_v54 = vld [vmem:[#allocation2 + $0x350] ss:$12 sps:$4 sm:$0xff]  }
  0x49   :  { %1558 = vmatprep.subr.bf16.mxu0 %v4127_v55  ;;  %3633 = vmatpush3.bf16.msra.mxu1 %v4172_v9  ;;  %v4254_v55 = vld [vmem:[#allocation2 + $0x428] ss:$12 sps:$4 sm:$0xff]   ;;  %v4273_v9 = vld [vmem:[#allocation2 + $0x3b0] ss:$12 sps:$4 sm:$0xff]  }
  0x4a   :  { %3634 = vmatprep.subr.bf16.mxu1 %v4179_v14  ;;  %v4230_v14 = vld [vmem:[#allocation2 + $0x318] ss:$12 sps:$4 sm:$0xff]  }
  0x4b   :  { %2039 = vmatmul.mubr.bf16.gmra.mrb[12].mxu1 %v4572_v56 }
  0x4c   :  { %1559 = vmatpush1.bf16.msra.mxu0 %v4130_v57  ;;  %2046 = vmatprep.mubr.bf16.mxu1 %v4577_v61  ;;  %v4212_v57 = vld [vmem:[#allocation2 + $0x2bc] ss:$12 sps:$4 sm:$0xff]  }
  0x4d   :  { %1560 = vmatprep.subr.bf16.mxu0 %v4131_v60  ;;  %3635 = vmatpush3.bf16.msra.mxu1 %v4180_v15  ;;  %v4259_v60 = vld [vmem:[#allocation2 + $0x440] ss:$12 sps:$4 sm:$0xff]  }
  0x4e   :  { %3636 = vmatprep.subr.bf16.mxu1 %v4184_v18  ;;  %v4239_v15 = vld [vmem:[#allocation2 + $0x334] ss:$12 sps:$4 sm:$0xff]   ;;  %v4245_v18 = vld [vmem:[#allocation2 + $0x34c] ss:$12 sps:$4 sm:$0xff]  }
  0x50   :  { %1561 = vmatpush1.bf16.msra.mxu0 %v4133_v0  ;;  %v4260_v0 = vld [vmem:[#allocation2 + $0x380] ss:$12 sps:$4 sm:$0xff]  }
  0x51   :  { %1643 = vmatprep.subr.bf16.mxu0 %v4138_v1  ;;  %3637 = vmatpush3.bf16.msra.mxu1 %v4185_v19  ;;  %v4267_v1 = vld [vmem:[#allocation2 + $0x458] ss:$12 sps:$4 sm:$0xff]  }
  0x52   :  { %v4712_v19 = vld [vmem:[%s5380_s0 + $0x15c] ss:$28 sps:$4 sm:$0xff]  }
  0x53   :  { %1563 = vmatmul.mubr.bf16.vlgmr.msra.gmra.mrb[0].mxu0 %v4536_v34  ;;  %2047 = vmatmul.mubr.bf16.gmra.mrb[16].mxu1 %v4584_v3  ;;  %v4228_v34 = vld [vmem:[#allocation2 + $0x3c8] ss:$12 sps:$4 sm:$0xff]  }
  0x54   :  { %1644 = vmatpush1.bf16.msra.mxu0 %v4136_v2  ;;  %1572 = vmatprep.mubr.bf16.mxu0 %v4541_v37  ;;  %v4194_v37 = vld [vmem:[#allocation2 + $0x25c] ss:$12 sps:$4 sm:$0xff]   ;;  %v4682_v2 = vld [vmem:[%s5380_s0 + $0xb0] ss:$28 sps:$4 sm:$0xff]  }
  0x55   :  { %1645 = vmatprep.subr.bf16.mxu0 %v4144_v6  ;;  %2054 = vmatprep.mubr.bf16.mxu1 %v4589_v7  ;;  %v4272_v6 = vld [vmem:[#allocation2 + $0x470] ss:$12 sps:$4 sm:$0xff]  }
  0x56   :  { %3686 = vmatprep.subr.bf16.mxu1 %v4228_v34  ;;  %v4279_v34 = vld [vmem:[#allocation2 + $0x3c4] ss:$12 sps:$4 sm:$0xff]  }
  0x58   :  { %1646 = vmatpush1.bf16.msra.mxu0 %v4142_v10  ;;  %v4224_v10 = vld [vmem:[#allocation2 + $0x300] ss:$12 sps:$4 sm:$0xff]  }
  0x59   :  { %1647 = vmatprep.subr.bf16.mxu0 %v4151_v11  ;;  %v4227_v11 = vld [vmem:[%s5380_s0 + $0xe8] ss:$28 sps:$4 sm:$0xff]  }
  0x5b   :  { %1573 = vmatmul.mubr.bf16.gmra.mrb[4].mxu0 %v4548_v40  ;;  %2055 = vmatmul.mubr.bf16.gmra.mrb[20].mxu1 %v4598_v13  ;;  %v4233_v40 = vld [vmem:[#allocation2 + $0x3e0] ss:$12 sps:$4 sm:$0xff]  }
  0x5c   :  { %1648 = vmatpush1.bf16.msra.mxu0 %v4149_v12  ;;  %1582 = vmatprep.mubr.bf16.mxu0 %v4553_v43  ;;  %v4197_v43 = vld [vmem:[#allocation2 + $0x270] ss:$12 sps:$4 sm:$0xff]  }
  0x5d   :  { %1649 = vmatprep.subr.bf16.mxu0 %v4157_v16  ;;  %2062 = vmatprep.mubr.bf16.mxu1 %v4603_v17  ;;  %v4232_v12 = vld [vmem:[#allocation2 + $0x31c] ss:$12 sps:$4 sm:$0xff]  }
  0x5e   :  { %v4237_v16 = vld [vmem:[#allocation2 + $0x330] ss:$12 sps:$4 sm:$0xff]  }
  0x60   :  { %1650 = vmatpush1.bf16.msra.mxu0 %v4155_v20  ;;  %v4243_v20 = vld [vmem:[#allocation2 + $0x348] ss:$12 sps:$4 sm:$0xff]  }
  0x61   :  { %1651 = vmatprep.subr.bf16.mxu0 %v4164_v21  ;;  %v4252_v21 = vld [vmem:[#allocation2 + $0x364] ss:$12 sps:$4 sm:$0xff]  }
  0x63   :  { %1583 = vmatmul.mubr.bf16.gmra.mrb[8].mxu0 %v4560_v46  ;;  %2063 = vmatmul.mubr.bf16.gmra.mrb[24].mxu1 %v4612_v23  ;;  %v4654_v46 = vld [vmem:[%s5380_s0 + $0x40] ss:$28 sps:$4 sm:$0xff]  }
  0x64   :  { %1652 = vmatpush1.bf16.msra.mxu0 %v4162_v22  ;;  %1592 = vmatprep.mubr.bf16.mxu0 %v4565_v51  ;;  %v4201_v51 = vld [vmem:[#allocation2 + $0x288] ss:$12 sps:$4 sm:$0xff]  }
  0x65   :  { %1653 = vmatprep.subr.bf16.mxu0 %v4170_v24  ;;  %2070 = vmatprep.mubr.bf16.mxu1 %v4617_v25  ;;  %v4316_v22 = vld [vmem:[#allocation2 + $0x488] ss:$12 sps:$4 sm:$0xff]  }
  0x66   :  { %v4721_v24 = vld [vmem:[%s5380_s0 + $0x158] ss:$28 sps:$4 sm:$0xff]  }
  0x68   :  { %1654 = vmatpush1.bf16.msra.mxu0 %v4168_v26  ;;  %v4726_v26 = vld [vmem:[%s5380_s0 + $0x194] ss:$28 sps:$4 sm:$0xff]  }
  0x69   :  { %1655 = vmatprep.subr.bf16.mxu0 %v4177_v27  ;;  %v4256_v27 = vld [vmem:[#allocation2 + $0x378] ss:$12 sps:$4 sm:$0xff]  }
  0x6b   :  { %1593 = vmatmul.mubr.bf16.gmra.mrb[12].mxu0 %v4572_v56  ;;  %2071 = vmatmul.mubr.bf16.gmra.mrb[28].mxu1 %v4626_v29  ;;  %v4668_v56 = vld [vmem:[%s5380_s0 + $0x78] ss:$28 sps:$4 sm:$0xff]  }
  0x6c   :  { %1656 = vmatpush1.bf16.msra.mxu0 %v4175_v28  ;;  %1602 = vmatprep.mubr.bf16.mxu0 %v4577_v61  ;;  %v4210_v61 = vld [vmem:[#allocation2 + $0x2b8] ss:$12 sps:$4 sm:$0xff]   ;;  %v4265_v28 = vld [vmem:[#allocation2 + $0x394] ss:$12 sps:$4 sm:$0xff]  }
  0x6d   :  { %1657 = vmatprep.subr.bf16.mxu0 %v4183_v30  ;;  %2111 = vmatprep.mubr.bf16.mxu1 %v4631_v31  ;;  %v4735_v30 = vld [vmem:[%s5380_s0 + $0x190] ss:$28 sps:$4 sm:$0xff]  }
  0x70   :  { %1658 = vmatpush1.bf16.msra.mxu0 %v4181_v32  ;;  %v4740_v32 = vld [vmem:[%s5380_s0 + $0x14] ss:$28 sps:$4 sm:$0xff]  }
  0x71   :  { %1659 = vmatprep.subr.bf16.mxu0 %v4191_v33  ;;  %v4269_v33 = vld [vmem:[#allocation2 + $0x3a8] ss:$12 sps:$4 sm:$0xff]  }
  0x73   :  { %1603 = vmatmul.mubr.bf16.gmra.mrb[16].mxu0 %v4584_v3  ;;  %2112 = vmatmul.mubr.bf16.vlgmr.msra.gmra.mrb[32].mxu1 %v4640_v35  ;;  %v4221_v3 = vld [vmem:[#allocation2 + $0x2ec] ss:$12 sps:$4 sm:$0xff]  }
  0x74   :  { %1660 = vmatpush1.bf16.msra.mxu0 %v4189_v36  ;;  %1612 = vmatprep.mubr.bf16.mxu0 %v4589_v7  ;;  %v4219_v7 = vld [vmem:[#allocation2 + $0x2e8] ss:$12 sps:$4 sm:$0xff]   ;;  %v4277_v36 = vld [vmem:[#allocation2 + $0x3c0] ss:$12 sps:$4 sm:$0xff]  }
  0x75   :  { %1661 = vmatprep.subr.bf16.mxu0 %v4194_v37  ;;  %2119 = vmatprep.mubr.bf16.mxu1 %v4645_v38  ;;  %v4282_v37 = vld [vmem:[#allocation2 + $0x3dc] ss:$12 sps:$4 sm:$0xff]  }
  0x76   :  { %3687 = vmatpush3.bf16.msra.mxu1 %v4229_v39  ;;  %v4317_v39 = vld [vmem:[#allocation2 + $0x4a0] ss:$12 sps:$4 sm:$0xff]  }
  0x77   :  { %3688 = vmatprep.subr.bf16.mxu1 %v4233_v40  ;;  %v4280_v40 = vld [vmem:[#allocation2 + $0x3d8] ss:$12 sps:$4 sm:$0xff]  }
  0x78   :  { %1662 = vmatpush1.bf16.msra.mxu0 %v4192_v41  ;;  %v4287_v41 = vld [vmem:[#allocation2 + $0x3f4] ss:$12 sps:$4 sm:$0xff]  }
  0x79   :  { %1663 = vmatprep.subr.bf16.mxu0 %v4199_v42  ;;  %v4285_v42 = vld [vmem:[#allocation2 + $0x3f0] ss:$12 sps:$4 sm:$0xff]  }
  0x7a   :  { %3689 = vmatpush3.bf16.msra.mxu1 %v4234_v44  ;;  %v4762_v44 = vld [vmem:[%s5380_s0 + $0x48] ss:$28 sps:$4 sm:$0xff]  }
  0x7b   :  { %1613 = vmatmul.mubr.bf16.gmra.mrb[20].mxu0 %v4598_v13  ;;  %3690 = vmatprep.subr.bf16.mxu1 %v4241_v45  ;;  %v4699_v13 = vld [vmem:[%s5380_s0 + $0x124] ss:$28 sps:$4 sm:$0xff]   ;;  %v4291_v45 = vld [vmem:[#allocation2 + $0x40c] ss:$12 sps:$4 sm:$0xff]  }
  0x7c   :  { %2120 = vmatmul.mubr.bf16.gmra.mrb[36].mxu1 %v4654_v46  ;;  %1664 = vmatpush1.bf16.msra.mxu0 %v4197_v43  ;;  %v4324_v43 = vld [vmem:[#allocation2 + $0x4b8] ss:$12 sps:$4 sm:$0xff]  }
  0x7d   :  { %1665 = vmatprep.subr.bf16.mxu0 %v4203_v47  ;;  %1622 = vmatprep.mubr.bf16.mxu0 %v4603_v17  ;;  %v4707_v17 = vld [vmem:[%s5380_s0 + $0x120] ss:$28 sps:$4 sm:$0xff]   ;;  %v4289_v47 = vld [vmem:[#allocation2 + $0x408] ss:$12 sps:$4 sm:$0xff]  }
  0x7e   :  { %2127 = vmatprep.mubr.bf16.mxu1 %v4659_v48  ;;  %3691 = vmatpush3.bf16.msra.mxu1 %v4242_v49  ;;  %v4296_v49 = vld [vmem:[#allocation2 + $0x424] ss:$12 sps:$4 sm:$0xff]  }
  0x7f   :  { %3692 = vmatprep.subr.bf16.mxu1 %v4246_v50  ;;  %v4332_v50 = vld [vmem:[#allocation2 + $0x4e8] ss:$12 sps:$4 sm:$0xff]  }
  0x80   :  { %1666 = vmatpush1.bf16.msra.mxu0 %v4201_v51  ;;  %v4294_v51 = vld [vmem:[#allocation2 + $0x420] ss:$12 sps:$4 sm:$0xff]  }
  0x81   :  { %1667 = vmatprep.subr.bf16.mxu0 %v4208_v52  ;;  %v4776_v52 = vld [vmem:[%s5380_s0 + $0x80] ss:$28 sps:$4 sm:$0xff]  }
  0x82   :  { %3693 = vmatpush3.bf16.msra.mxu1 %v4247_v54  ;;  %v4781_v54 = vld [vmem:[%s5380_s0 + $0xbc] ss:$28 sps:$4 sm:$0xff]  }
  0x83   :  { %1623 = vmatmul.mubr.bf16.gmra.mrb[24].mxu0 %v4612_v23  ;;  %3694 = vmatprep.subr.bf16.mxu1 %v4254_v55  ;;  %v4250_v23 = vld [vmem:[#allocation2 + $0x360] ss:$12 sps:$4 sm:$0xff]   ;;  %v4298_v55 = vld [vmem:[#allocation2 + $0x438] ss:$12 sps:$4 sm:$0xff]  }
  0x84   :  { %2128 = vmatmul.mubr.bf16.gmra.mrb[40].mxu1 %v4668_v56  ;;  %1668 = vmatpush1.bf16.msra.mxu0 %v4206_v53  ;;  %v4300_v53 = vld [vmem:[#allocation2 + $0x43c] ss:$12 sps:$4 sm:$0xff]  }
  0x85   :  { %1669 = vmatprep.subr.bf16.mxu0 %v4212_v57  ;;  %1632 = vmatprep.mubr.bf16.mxu0 %v4617_v25  ;;  %v4258_v25 = vld [vmem:[#allocation2 + $0x37c] ss:$12 sps:$4 sm:$0xff]   ;;  %v4333_v57 = vld [vmem:[#allocation2 + $0x500] ss:$12 sps:$4 sm:$0xff]  }
  0x86   :  { %2135 = vmatprep.mubr.bf16.mxu1 %v4673_v58  ;;  %3695 = vmatpush3.bf16.msra.mxu1 %v4255_v59  ;;  %v4303_v59 = vld [vmem:[#allocation2 + $0x450] ss:$12 sps:$4 sm:$0xff]  }
  0x87   :  { %3696 = vmatprep.subr.bf16.mxu1 %v4259_v60  ;;  %v4790_v60 = vld [vmem:[%s5380_s0 + $0xb8] ss:$28 sps:$4 sm:$0xff]  }
  0x88   :  { %1670 = vmatpush1.bf16.msra.mxu0 %v4210_v61  ;;  %v4309_v61 = vld [vmem:[#allocation2 + $0x46c] ss:$12 sps:$4 sm:$0xff]  }
  0x89   :  { %1671 = vmatprep.subr.bf16.mxu0 %v4217_v62  ;;  %v4795_v62 = vld [vmem:[%s5380_s0 + $0xf4] ss:$28 sps:$4 sm:$0xff]  }
  0x8a   :  { %3697 = vmatpush3.bf16.msra.mxu1 %v4260_v0  ;;  %v4307_v0 = vld [vmem:[#allocation2 + $0x468] ss:$12 sps:$4 sm:$0xff]  }
  0x8b   :  { %1633 = vmatmul.mubr.bf16.gmra.mrb[28].mxu0 %v4626_v29  ;;  %3698 = vmatprep.subr.bf16.mxu1 %v4267_v1  ;;  %v4263_v29 = vld [vmem:[#allocation2 + $0x390] ss:$12 sps:$4 sm:$0xff]  }
  0x8c   :  { %2136 = vmatmul.mubr.bf16.gmra.mrb[44].mxu1 %v4682_v2  ;;  %1672 = vmatpush1.bf16.msra.mxu0 %v4215_v63  ;;  %v4341_v63 = vld [vmem:[#allocation2 + $0x530] ss:$12 sps:$4 sm:$0xff]  }
  0x8d   :  { %1673 = vmatprep.subr.bf16.mxu0 %v4221_v3  ;;  %1675 = vmatprep.mubr.bf16.mxu0 %v4631_v31  ;;  %v4271_v31 = vld [vmem:[#allocation2 + $0x3ac] ss:$12 sps:$4 sm:$0xff]   ;;  %v4314_v1 = vld [vmem:[#allocation2 + $0x484] ss:$12 sps:$4 sm:$0xff]  }
  0x8e   :  { %2143 = vmatprep.mubr.bf16.mxu1 %v4687_v4  ;;  %3699 = vmatpush3.bf16.msra.mxu1 %v4268_v5  ;;  %v4315_v3 = vld [vmem:[%s5380_s0 + $0xf0] ss:$28 sps:$4 sm:$0xff]   ;;  %v4322_v5 = vld [vmem:[#allocation2 + $0x49c] ss:$12 sps:$4 sm:$0xff]  }
  0x8f   :  { %3700 = vmatprep.subr.bf16.mxu1 %v4272_v6  ;;  %v4320_v6 = vld [vmem:[#allocation2 + $0x498] ss:$12 sps:$4 sm:$0xff]  }
  0x90   :  { %1674 = vmatpush1.bf16.msra.mxu0 %v4219_v7  ;;  %v4330_v7 = vld [vmem:[#allocation2 + $0x4b4] ss:$12 sps:$4 sm:$0xff]  }
  0x91   :  { %1756 = vmatprep.subr.bf16.mxu0 %v4226_v8  ;;  %v4323_v8 = vld [vmem:[%s5380_s0 + $0x128] ss:$28 sps:$4 sm:$0xff]  }
  0x92   :  { %3701 = vmatpush3.bf16.msra.mxu1 %v4273_v9  ;;  %v4326_v9 = vld [vmem:[%s5380_s0 + $0x164] ss:$28 sps:$4 sm:$0xff]  }
  0x93   :  { %1676 = vmatmul.mubr.bf16.vlgmr.msra.gmra.mrb[0].mxu0 %v4640_v35  ;;  %3830 = vmatprep.subr.bf16.mxu1 %v4316_v22  ;;  %v4749_v35 = vld [vmem:[%s5380_s0 + $0x10] ss:$28 sps:$4 sm:$0xff]  }
  0x94   :  { %2144 = vmatmul.mubr.bf16.gmra.mrb[48].mxu1 %v4227_v11  ;;  %1757 = vmatpush1.bf16.msra.mxu0 %v4224_v10  ;;  %v4328_v10 = vld [vmem:[#allocation2 + $0x4b0] ss:$12 sps:$4 sm:$0xff]  }
  0x95   :  { %1758 = vmatprep.subr.bf16.mxu0 %v4232_v12  ;;  %1685 = vmatprep.mubr.bf16.mxu0 %v4645_v38  ;;  %v4754_v38 = vld [vmem:[%s5380_s0 + $0x4c] ss:$28 sps:$4 sm:$0xff]  }
  0x96   :  { %2151 = vmatprep.mubr.bf16.mxu1 %v4699_v13  ;;  %v4336_v12 = vld [vmem:[#allocation2 + $0x4c8] ss:$12 sps:$4 sm:$0xff]  }
  0x98   :  { %1759 = vmatpush1.bf16.msra.mxu0 %v4230_v14  ;;  %v4331_v14 = vld [vmem:[%s5380_s0 + $0x160] ss:$28 sps:$4 sm:$0xff]  }
  0x99   :  { %1760 = vmatprep.subr.bf16.mxu0 %v4239_v15  ;;  %v4334_v15 = vld [vmem:[%s5380_s0 + $0x19c] ss:$28 sps:$4 sm:$0xff]  }
  0x9b   :  { %1686 = vmatmul.mubr.bf16.gmra.mrb[4].mxu0 %v4654_v46  ;;  %v4767_v46 = vld [vmem:[%s5380_s0 + $0x84] ss:$28 sps:$4 sm:$0xff]  }
  0x9c   :  { %2152 = vmatmul.mubr.bf16.gmra.mrb[52].mxu1 %v4707_v17  ;;  %1761 = vmatpush1.bf16.msra.mxu0 %v4237_v16  ;;  %v4343_v16 = vld [vmem:[#allocation2 + $0x4e0] ss:$12 sps:$4 sm:$0xff]  }
  0x9d   :  { %1762 = vmatprep.subr.bf16.mxu0 %v4245_v18  ;;  %1695 = vmatprep.mubr.bf16.mxu0 %v4659_v48  ;;  %v4325_v48 = vld [vmem:[#allocation2 + $0x4d0] ss:$12 sps:$4 sm:$0xff]   ;;  %v4348_v18 = vld [vmem:[#allocation2 + $0x4f8] ss:$12 sps:$4 sm:$0xff]  }
  0x9e   :  { %2159 = vmatprep.mubr.bf16.mxu1 %v4712_v19 }
  0xa0   :  { %1763 = vmatpush1.bf16.msra.mxu0 %v4243_v20  ;;  %v4339_v20 = vld [vmem:[%s5380_s0 + $0x198] ss:$28 sps:$4 sm:$0xff]  }
  0xa1   :  { %1764 = vmatprep.subr.bf16.mxu0 %v4252_v21  ;;  %v4342_v21 = vld [vmem:[%s5380_s0 + $0x18] ss:$28 sps:$4 sm:$0xff]  }
  0xa3   :  { %1696 = vmatmul.mubr.bf16.gmra.mrb[8].mxu0 %v4668_v56  ;;  %v4305_v56 = vld [vmem:[#allocation2 + $0x454] ss:$12 sps:$4 sm:$0xff]  }
  0xa4   :  { %2160 = vmatmul.mubr.bf16.gmra.mrb[56].mxu1 %v4721_v24  ;;  %1765 = vmatpush1.bf16.msra.mxu0 %v4250_v23  ;;  %v4360_v23 = vld [vmem:[#allocation2 + $0x52c] ss:$12 sps:$4 sm:$0xff]  }
  0xa5   :  { %1766 = vmatprep.subr.bf16.mxu0 %v4258_v25  ;;  %1705 = vmatprep.mubr.bf16.mxu0 %v4673_v58  ;;  %v4340_v58 = vld [vmem:[#allocation2 + $0x518] ss:$12 sps:$4 sm:$0xff]   ;;  %v4346_v25 = vld [vmem:[%s5380_s0 + $0x50] ss:$28 sps:$4 sm:$0xff]  }
  0xa6   :  { %2167 = vmatprep.mubr.bf16.mxu1 %v4726_v26 }
  0xa8   :  { %1767 = vmatpush1.bf16.msra.mxu0 %v4256_v27  ;;  %v4351_v27 = vld [vmem:[%s5380_s0 + $0xc0] ss:$28 sps:$4 sm:$0xff]  }
  0xa9   :  { %1768 = vmatprep.subr.bf16.mxu0 %v4265_v28  ;;  %v4352_v28 = vld [vmem:[%s5380_s0 + $0xf8] ss:$28 sps:$4 sm:$0xff]  }
  0xab   :  { %1706 = vmatmul.mubr.bf16.gmra.mrb[12].mxu0 %v4682_v2  ;;  %v4312_v2 = vld [vmem:[#allocation2 + $0x480] ss:$12 sps:$4 sm:$0xff]  }
  0xac   :  { %2168 = vmatmul.mubr.bf16.gmra.mrb[60].mxu1 %v4735_v30  ;;  %1769 = vmatpush1.bf16.msra.mxu0 %v4263_v29  ;;  %v4848_v29 = vld [vmem:[%s5380_s0 + $0x130] ss:$28 sps:$4 sm:$0xff]  }
  0xad   :  { %1770 = vmatprep.subr.bf16.mxu0 %v4271_v31  ;;  %1715 = vmatprep.mubr.bf16.mxu0 %v4687_v4  ;;  %v4318_v4 = vld [vmem:[%s5380_s0 + $0x12c] ss:$28 sps:$4 sm:$0xff]  }
  0xae   :  { %2208 = vmatprep.mubr.bf16.mxu1 %v4740_v32 }
  0xb0   :  { %1771 = vmatpush1.bf16.msra.mxu0 %v4269_v33 }
  0xb1   :  { %1772 = vmatprep.subr.bf16.mxu0 %v4279_v34 }
  0xb3   :  { %1716 = vmatmul.mubr.bf16.gmra.mrb[16].mxu0 %v4227_v11  ;;  %v4338_v11 = vld [vmem:[#allocation2 + $0x4cc] ss:$12 sps:$4 sm:$0xff]  }
  0xb4   :  { %2209 = vmatmul.mubr.bf16.vlgmr.msra.gmra.mrb[64].mxu1 %v4749_v35  ;;  %1773 = vmatpush1.bf16.msra.mxu0 %v4277_v36 }
  0xb5   :  { %1774 = vmatprep.subr.bf16.mxu0 %v4282_v37  ;;  %1725 = vmatprep.mubr.bf16.mxu0 %v4699_v13  ;;  %v4345_v13 = vld [vmem:[#allocation2 + $0x4e4] ss:$12 sps:$4 sm:$0xff]  }
  0xb6   :  { %2216 = vmatprep.mubr.bf16.mxu1 %v4754_v38  ;;  %3831 = vmatpush3.bf16.msra.mxu1 %v4316_v22  ;;  %v4353_v22 = vld [vmem:[#allocation2 + $0x510] ss:$12 sps:$4 sm:$0xff]  }
  0xb7   :  { %3832 = vmatprep.subr.bf16.mxu1 %v4317_v39 }
  0xb8   :  { %1775 = vmatpush1.bf16.msra.mxu0 %v4280_v40 }
  0xb9   :  { %1776 = vmatprep.subr.bf16.mxu0 %v4287_v41 }
  0xba   :  { %3833 = vmatpush3.bf16.msra.mxu1 %v4317_v39 }
  0xbb   :  { %1726 = vmatmul.mubr.bf16.gmra.mrb[20].mxu0 %v4707_v17  ;;  %3834 = vmatprep.subr.bf16.mxu1 %v4324_v43  ;;  %v4350_v17 = vld [vmem:[#allocation2 + $0x4fc] ss:$12 sps:$4 sm:$0xff]  }
  0xbc   :  { %2217 = vmatmul.mubr.bf16.gmra.mrb[68].mxu1 %v4762_v44  ;;  %1777 = vmatpush1.bf16.msra.mxu0 %v4285_v42 }
  0xbd   :  { %1778 = vmatprep.subr.bf16.mxu0 %v4291_v45  ;;  %1735 = vmatprep.mubr.bf16.mxu0 %v4712_v19  ;;  %v4355_v19 = vld [vmem:[#allocation2 + $0x514] ss:$12 sps:$4 sm:$0xff]  }
  0xbe   :  { %2224 = vmatprep.mubr.bf16.mxu1 %v4767_v46  ;;  %3835 = vmatpush3.bf16.msra.mxu1 %v4324_v43 }
  0xbf   :  { %3836 = vmatprep.subr.bf16.mxu1 %v4325_v48 }
  0xc0   :  { %1779 = vmatpush1.bf16.msra.mxu0 %v4289_v47 }
  0xc1   :  { %1780 = vmatprep.subr.bf16.mxu0 %v4296_v49 }
  0xc2   :  { %3837 = vmatpush3.bf16.msra.mxu1 %v4325_v48 }
  0xc3   :  { %1736 = vmatmul.mubr.bf16.gmra.mrb[24].mxu0 %v4721_v24  ;;  %3838 = vmatprep.subr.bf16.mxu1 %v4332_v50  ;;  %v4358_v24 = vld [vmem:[#allocation2 + $0x528] ss:$12 sps:$4 sm:$0xff]  }
  0xc4   :  { %2225 = vmatmul.mubr.bf16.gmra.mrb[72].mxu1 %v4776_v52  ;;  %1781 = vmatpush1.bf16.msra.mxu0 %v4294_v51 }
  0xc5   :  { %1782 = vmatprep.subr.bf16.mxu0 %v4300_v53  ;;  %1745 = vmatprep.mubr.bf16.mxu0 %v4726_v26  ;;  %v4347_v26 = vld [vmem:[%s5380_s0 + $0x88] ss:$28 sps:$4 sm:$0xff]  }
  0xc6   :  { %2232 = vmatprep.mubr.bf16.mxu1 %v4781_v54  ;;  %3839 = vmatpush3.bf16.msra.mxu1 %v4332_v50 }
  0xc7   :  { %3840 = vmatprep.subr.bf16.mxu1 %v4333_v57 }
  0xc8   :  { %1783 = vmatpush1.bf16.msra.mxu0 %v4298_v55 }
  0xc9   :  { %1784 = vmatprep.subr.bf16.mxu0 %v4305_v56 }
  0xca   :  { %3841 = vmatpush3.bf16.msra.mxu1 %v4333_v57 }
  0xcb   :  { %1746 = vmatmul.mubr.bf16.gmra.mrb[28].mxu0 %v4735_v30  ;;  %3842 = vmatprep.subr.bf16.mxu1 %v4340_v58  ;;  %v4853_v30 = vld [vmem:[%s5380_s0 + $0x168] ss:$28 sps:$4 sm:$0xff]  }
  0xcc   :  { %2233 = vmatmul.mubr.bf16.gmra.mrb[76].mxu1 %v4790_v60  ;;  %1785 = vmatpush1.bf16.msra.mxu0 %v4303_v59 }
  0xcd   :  { %1786 = vmatprep.subr.bf16.mxu0 %v4309_v61  ;;  %1788 = vmatprep.mubr.bf16.mxu0 %v4740_v32  ;;  %v4860_v32 = vld [vmem:[%s5380_s0 + $0x1a0] ss:$28 sps:$4 sm:$0xff]  }
  0xce   :  { %2240 = vmatprep.mubr.bf16.mxu1 %v4795_v62  ;;  %3843 = vmatpush3.bf16.msra.mxu1 %v4340_v58 }
  0xcf   :  { %3844 = vmatprep.subr.bf16.mxu1 %v4341_v63 }
  0xd0   :  { %1787 = vmatpush1.bf16.msra.mxu0 %v4307_v0 }
  0xd1   :  { %1869 = vmatprep.subr.bf16.mxu0 %v4314_v1  ;;  %v4364_v1 = vld [vmem:[%s5383_s3 + $0x4] ss:$8 sps:$4 sm:$0xff]  }
  0xd2   :  { %3845 = vmatpush3.bf16.msra.mxu1 %v4341_v63 }
  0xd3   :  { %1789 = vmatmul.mubr.bf16.vlgmr.msra.gmra.mrb[0].mxu0 %v4749_v35  ;;  %2742 = vmatprep.subr.bf16.mxu1 %v4364_v1 }
  0xd4   :  { %2241 = vmatmul.mubr.bf16.gmra.mrb[80].mxu1 %v4315_v3  ;;  %1870 = vmatpush1.bf16.msra.mxu0 %v4312_v2 }
  0xd5   :  { %1798 = vmatprep.mubr.bf16.mxu0 %v4754_v38  ;;  %2248 = vmatprep.mubr.bf16.mxu1 %v4318_v4  ;;  %v4477_v38 = vmov 0  }
  0xd6   :  { %1871 = vmatprep.subr.bf16.mxu0 %v4322_v5 }
  0xd8   :  { %1872 = vmatpush1.bf16.msra.mxu0 %v4320_v6 }
  0xd9   :  { %1873 = vmatprep.subr.bf16.mxu0 %v4330_v7  ;;  %v4365_v7 = vld [vmem:[%s5383_s3 + $0x10] ss:$8 sps:$4 sm:$0xff]  }
  0xdb   :  { %1799 = vmatmul.mubr.bf16.gmra.mrb[4].mxu0 %v4762_v44 }
  0xdc   :  { %2249 = vmatmul.mubr.bf16.gmra.mrb[84].mxu1 %v4323_v8  ;;  %1808 = vmatprep.mubr.bf16.mxu0 %v4767_v46 }
  0xdd   :  { %2256 = vmatprep.mubr.bf16.mxu1 %v4326_v9  ;;  %1874 = vmatpush1.bf16.msra.mxu0 %v4328_v10 }
  0xde   :  { %1875 = vmatprep.subr.bf16.mxu0 %v4338_v11 }
  0xe1   :  { %1876 = vmatpush1.bf16.msra.mxu0 %v4336_v12  ;;  %v4370_v12 = vld [vmem:[%s5383_s3 + $0x24] ss:$8 sps:$4 sm:$0xff]  }
  0xe2   :  { %1877 = vmatprep.subr.bf16.mxu0 %v4345_v13 }
  0xe3   :  { %1809 = vmatmul.mubr.bf16.gmra.mrb[8].mxu0 %v4776_v52 }
  0xe4   :  { %2257 = vmatmul.mubr.bf16.gmra.mrb[88].mxu1 %v4331_v14  ;;  %1818 = vmatprep.mubr.bf16.mxu0 %v4781_v54 }
  0xe5   :  { %2264 = vmatprep.mubr.bf16.mxu1 %v4334_v15  ;;  %1878 = vmatpush1.bf16.msra.mxu0 %v4343_v16 }
  0xe6   :  { %1879 = vmatprep.subr.bf16.mxu0 %v4350_v17 }
  0xe9   :  { %1880 = vmatpush1.bf16.msra.mxu0 %v4348_v18 }
  0xea   :  { %1881 = vmatprep.subr.bf16.mxu0 %v4355_v19  ;;  %v4371_v19 = vld [vmem:[%s5383_s3 + $0x30] ss:$8 sps:$4 sm:$0xff]  }
  0xeb   :  { %1819 = vmatmul.mubr.bf16.gmra.mrb[12].mxu0 %v4790_v60 }
  0xec   :  { %2265 = vmatmul.mubr.bf16.gmra.mrb[92].mxu1 %v4339_v20  ;;  %1828 = vmatprep.mubr.bf16.mxu0 %v4795_v62 }
  0xed   :  { %3846 = vmatprep.mubr.bf16.mxu1 %v4342_v21  ;;  %1882 = vmatpush1.bf16.msra.mxu0 %v4353_v22 }
  0xee   :  { %1883 = vmatprep.subr.bf16.mxu0 %v4360_v23  ;;  %v4929_v23 = vld [vmem:[%s5382_s2] sm:$0x7] }
  0xf1   :  { %1884 = vmatpush1.bf16.msra.mxu0 %v4358_v24 }
  0xf3   :  { %1829 = vmatmul.mubr.bf16.gmra.mrb[16].mxu0 %v4315_v3 }
  0xf4   :  { %3847 = vmatmul.mubr.bf16.vlgmr.msra.gmra.mrb[96].mxu1 %v4346_v25  ;;  %1838 = vmatprep.mubr.bf16.mxu0 %v4318_v4  ;;  %v4362_v4 = vld [vmem:[%s5383_s3] ss:$8 sps:$4 sm:$0xff]  }
  0xf5   :  { %3850 = vmatprep.mubr.bf16.mxu1 %v4347_v26  ;;  %2743 = vmatpush1.bf16.msra.mxu1 %v4362_v4  ;;  %v4391_v4 = vld [vmem:[%s5383_s3 + $0x94] ss:$8 sps:$4 sm:$0xff]  }
  0xfb   :  { %1839 = vmatmul.mubr.bf16.gmra.mrb[20].mxu0 %v4323_v8  ;;  %v4367_v8 = vld [vmem:[%s5383_s3 + $0x14] ss:$8 sps:$4 sm:$0xff]  }
  0xfc   :  { %3851 = vmatmul.mubr.bf16.gmra.mrb[100].mxu1 %v4351_v27  ;;  %1848 = vmatprep.mubr.bf16.mxu0 %v4326_v9  ;;  %v331_v9 = vlaneseq }
  0xfd   :  { %3854 = vmatprep.mubr.bf16.mxu1 %v4352_v28  ;;  %2744 = vmatprep.subr.bf16.mxu1 %v4367_v8 }
  0xfe   :  { %2745 = vmatpush1.bf16.msra.mxu1 %v4365_v7  ;;  %v4914_v17 = vshrl.u32 %v331_v9, 7 }
  0xff   :  { %2746 = vmatprep.subr.bf16.mxu1 %v4370_v12 }
 0x103   :  { %1849 = vmatmul.mubr.bf16.gmra.mrb[24].mxu0 %v4331_v14 }
 0x104   :  { %3855 = vmatmul.mubr.bf16.gmra.mrb[104].mxu1 %v4848_v29  ;;  %1858 = vmatprep.mubr.bf16.mxu0 %v4334_v15  ;;  %v4368_v15 = vld [vmem:[%s5383_s3 + $0x20] ss:$8 sps:$4 sm:$0xff]  }
 0x105   :  { %3858 = vmatprep.mubr.bf16.mxu1 %v4853_v30  ;;  %2747 = vmatpush1.bf16.msra.mxu1 %v4368_v15  ;;  %v4392_v15 = vld [vmem:[%s5383_s3 + $0xa0] ss:$8 sps:$4 sm:$0xff]  }
 0x106   :  { %v3574_v31 = vpop.f32.mrb[0].mxu1 }
 0x107   :  { %v3575_v33 = vpop.f32.mrb[1].mxu1 }
 0x108   :  { %v4862_v34 = vadd.f32 %v3575_v33, %v3574_v31  ;;  %v3577_v35 = vpop.f32.mrb[2].mxu1 }
 0x109   :  { %v3578_v36 = vpop.f32.mrb[3].mxu1 }
 0x10a   :  { %v4864_v37 = vadd.f32 %v3578_v36, %v3577_v35  ;;  %v4377_v35 = vld [vmem:[%s5383_s3 + $0x50] ss:$8 sps:$4 sm:$0xff]   ;;  %v4379_v36 = vld [vmem:[%s5383_s3 + $0x54] ss:$8 sps:$4 sm:$0xff]  }
 0x10b   :  { %1859 = vmatmul.mubr.bf16.gmra.mrb[28].mxu0 %v4339_v20  ;;  %v4373_v20 = vld [vmem:[%s5383_s3 + $0x34] ss:$8 sps:$4 sm:$0xff]  }
 0x10c   :  { %3859 = vmatmul.mubr.bf16.gmra.mrb[108].mxu1 %v4860_v32  ;;  %1901 = vmatprep.mubr.bf16.mxu0 %v4477_v38 }
 0x10d   :  { %2748 = vmatprep.subr.bf16.mxu1 %v4373_v20  ;;  %v4397_v20 = vld [vmem:[%s5383_s3 + $0xb4] ss:$8 sps:$4 sm:$0xff]  }
 0x10e   :  { %v3580_v39 = vpop.f32.mrb[4].mxu1  ;;  %2749 = vmatpush1.bf16.msra.mxu1 %v4371_v19 }
 0x10f   :  { %v3581_v40 = vpop.f32.mrb[5].mxu1 }
 0x110   :  { %v4868_v41 = vadd.f32 %v3581_v40, %v3580_v39  ;;  %v3583_v42 = vpop.f32.mrb[6].mxu1 }
 0x111   :  { %v3584_v43 = vpop.f32.mrb[7].mxu1 }
 0x112   :  { %v4870_v44 = vadd.f32 %v3584_v43, %v3583_v42  ;;  %v4382_v42 = vld [vmem:[%s5383_s3 + $0x64] ss:$8 sps:$4 sm:$0xff]  }
 0x113   :  { %1902 = vmatmul.mubr.bf16.vlgmr.msra.gmra.mrb[0].mxu0 %v4342_v21  ;;  %v341_v21 = vsub.s32 2, %v4914_v17 }
 0x114   :  { %1911 = vmatprep.mubr.bf16.mxu0 %v4477_v38 }
 0x115   :  { %v4941_v31 = vrot.slane %v4929_v23, %v341_v21 }
 0x116   :  { %v3586_v45 = vpop.f32.mrb[8].mxu1 }
 0x117   :  { %v3587_v46 = vpop.f32.mrb[9].mxu1  ;;  %v2020_v43 = vadd.f32 %v4864_v37, %v4941_v31  ;;  %v4383_v37 = vld [vmem:[%s5383_s3 + $0x70] ss:$8 sps:$4 sm:$0xff]  }
 0x118   :  { %v4873_v47 = vadd.f32 %v3587_v46, %v3586_v45  ;;  %v3589_v48 = vpop.f32.mrb[10].mxu1 }
 0x119   :  { %v3590_v49 = vpop.f32.mrb[11].mxu1 }
 0x11a   :  { %v4875_v50 = vadd.f32 %v3590_v49, %v3589_v48  ;;  %v4380_v48 = vld [vmem:[%s5383_s3 + $0x60] ss:$8 sps:$4 sm:$0xff]   ;;  %v2033_v7 = vadd.f32 %v4873_v47, %v4941_v31 }
 0x11b   :  { %1912 = vmatmul.mubr.bf16.gmra.mrb[4].mxu0 %v4346_v25  ;;  %v4376_v25 = vld [vmem:[%s5383_s3 + $0x44] ss:$8 sps:$4 sm:$0xff]  }
 0x11c   :  { %1921 = vmatprep.mubr.bf16.mxu0 %v4477_v38  ;;  %2750 = vmatprep.subr.bf16.mxu1 %v4376_v25 }
 0x11e   :  { %v3592_v51 = vpop.f32.mrb[12].mxu1 }
 0x11f   :  { %v3593_v52 = vpop.f32.mrb[13].mxu1 }
 0x120   :  { %v4878_v53 = vadd.f32 %v3593_v52, %v3592_v51  ;;  %v3595_v54 = vpop.f32.mrb[14].mxu1  ;;  %v4385_v52 = vld [vmem:[%s5383_s3 + $0x74] ss:$8 sps:$4 sm:$0xff]  }
 0x121   :  { %v3596_v55 = vpop.f32.mrb[15].mxu1 }
 0x122   :  { %v4880_v56 = vadd.f32 %v3596_v55, %v3595_v54  ;;  %v2025_v55 = vadd.f32 %v4868_v41, %v4941_v31 }
 0x123   :  { %1922 = vmatmul.mubr.bf16.gmra.mrb[8].mxu0 %v4347_v26 }
 0x124   :  { %1931 = vmatprep.mubr.bf16.mxu0 %v4477_v38 }
 0x126   :  { %v3598_v57 = vpop.f32.mrb[16].mxu1 }
 0x127   :  { %v3599_v58 = vpop.f32.mrb[17].mxu1 }
 0x128   :  { %v4883_v59 = vadd.f32 %v3599_v58, %v3598_v57  ;;  %v3601_v60 = vpop.f32.mrb[18].mxu1  ;;  %v4388_v58 = vld [vmem:[%s5383_s3 + $0x84] ss:$8 sps:$4 sm:$0xff]  }
 0x129   :  { %v3602_v61 = vpop.f32.mrb[19].mxu1 }
 0x12a   :  { %v4885_v62 = vadd.f32 %v3602_v61, %v3601_v60  ;;  %v2028_v60 = vadd.f32 %v4870_v44, %v4941_v31  ;;  %v4389_v44 = vld [vmem:[%s5383_s3 + $0x90] ss:$8 sps:$4 sm:$0xff]  }
 0x12b   :  { %1932 = vmatmul.mubr.bf16.gmra.mrb[12].mxu0 %v4351_v27 }
 0x12c   :  { %1941 = vmatprep.mubr.bf16.mxu0 %v4477_v38 }
 0x12e   :  { %v3604_v63 = vpop.f32.mrb[20].mxu1 }
 0x12f   :  { %v3605_v0 = vpop.f32.mrb[21].mxu1 }
 0x130   :  { %v4891_v2 = vadd.f32 %v3605_v0, %v3604_v63  ;;  %v3607_v3 = vpop.f32.mrb[22].mxu1  ;;  %v4386_v0 = vld [vmem:[%s5383_s3 + $0x80] ss:$8 sps:$4 sm:$0xff]  }
 0x131   :  { %v3608_v5 = vpop.f32.mrb[23].mxu1 }
 0x132   :  { %v4896_v6 = vadd.f32 %v3608_v5, %v3607_v3 }
 0x133   :  { %1942 = vmatmul.mubr.bf16.gmra.mrb[16].mxu0 %v4352_v28  ;;  %v4374_v28 = vld [vmem:[%s5383_s3 + $0x40] ss:$8 sps:$4 sm:$0xff]  }
 0x134   :  { %1951 = vmatprep.mubr.bf16.mxu0 %v4477_v38  ;;  %2751 = vmatpush1.bf16.msra.mxu1 %v4374_v28  ;;  %v2044_v28 = vadd.f32 %v4880_v56, %v4941_v31  ;;  %v4401_v56 = vld [vmem:[%s5383_s3 + $0xd0] ss:$8 sps:$4 sm:$0xff]  }
 0x135   :  { %2752 = vmatprep.subr.bf16.mxu1 %v4379_v36  ;;  %v4398_v36 = vld [vmem:[%s5383_s3 + $0xc0] ss:$8 sps:$4 sm:$0xff]  }
 0x136   :  { %v3610_v10 = vpop.f32.mrb[24].mxu1 }
 0x137   :  { %v3611_v11 = vpop.f32.mrb[25].mxu1 }
 0x138   :  { %v4908_v13 = vadd.f32 %v3611_v11, %v3610_v10  ;;  %v3613_v14 = vpop.f32.mrb[26].mxu1  ;;  %2753 = vmatpush1.bf16.msra.mxu1 %v4377_v35  ;;  %v4394_v10 = vld [vmem:[%s5383_s3 + $0xa4] ss:$8 sps:$4 sm:$0xff]   ;;  %v2036_v11 = vadd.f32 %v4875_v50, %v4941_v31  ;;  %v4395_v50 = vld [vmem:[%s5383_s3 + $0xb0] ss:$8 sps:$4 sm:$0xff]  }
 0x139   :  { %v3614_v16 = vpop.f32.mrb[27].mxu1  ;;  %2754 = vmatprep.subr.bf16.mxu1 %v4382_v42 }
 0x13a   :  { %v4916_v18 = vadd.f32 %v3614_v16, %v3613_v14 }
 0x13b   :  { %1952 = vmatmul.mubr.bf16.gmra.mrb[20].mxu0 %v4848_v29 }
 0x13c   :  { %1961 = vmatprep.mubr.bf16.mxu0 %v4477_v38  ;;  %2755 = vmatpush1.bf16.msra.mxu1 %v4380_v48  ;;  %v4406_v48 = vld [vmem:[%s5383_s3 + $0xe4] ss:$8 sps:$4 sm:$0xff]  }
 0x13d   :  { %2756 = vmatprep.subr.bf16.mxu1 %v4385_v52 }
 0x13e   :  { %v3616_v22 = vpop.f32.mrb[28].mxu1 }
 0x13f   :  { %v3617_v24 = vpop.f32.mrb[29].mxu1 }
 0x140   :  { %v4934_v26 = vadd.f32 %v3617_v24, %v3616_v22  ;;  %v3619_v27 = vpop.f32.mrb[30].mxu1  ;;  %2757 = vmatpush1.bf16.msra.mxu1 %v4383_v37  ;;  %v2041_v22 = vadd.f32 %v4878_v53, %v4941_v31  ;;  %v4404_v37 = vld [vmem:[%s5383_s3 + $0xe0] ss:$8 sps:$4 sm:$0xff]  }
 0x141   :  { %v3620_v29 = vpop.f32.mrb[31].mxu1  ;;  %2758 = vmatprep.subr.bf16.mxu1 %v4388_v58 }
 0x142   :  { %v4943_v33 = vadd.f32 %v3620_v29, %v3619_v27  ;;  %v4400_v27 = vld [vmem:[%s5383_s3 + $0xc4] ss:$8 sps:$4 sm:$0xff]  }
 0x143   :  { %1962 = vmatmul.mubr.bf16.gmra.mrb[24].mxu0 %v4853_v30  ;;  %v2017_v30 = vadd.f32 %v4862_v34, %v4941_v31 }
 0x144   :  { %1971 = vmatprep.mubr.bf16.mxu0 %v4477_v38  ;;  %2759 = vmatpush1.bf16.msra.mxu1 %v4386_v0  ;;  %v2060_v0 = vadd.f32 %v4896_v6, %v4941_v31  ;;  %v2068_v6 = vadd.f32 %v4916_v18, %v4941_v31 }
 0x145   :  { %2760 = vmatprep.subr.bf16.mxu1 %v4391_v4 }
 0x146   :  { %v3638_v39 = vpop.f32.mrb[32].mxu1 }
 0x147   :  { %v3639_v40 = vpop.f32.mrb[33].mxu1 }
 0x148   :  { %v3640_v45 = vadd.f32 %v3639_v40, %v3638_v39  ;;  %v3641_v46 = vpop.f32.mrb[34].mxu1  ;;  %2761 = vmatpush1.bf16.msra.mxu1 %v4389_v44  ;;  %v4403_v40 = vld [vmem:[%s5383_s3 + $0xd4] ss:$8 sps:$4 sm:$0xff]  }
 0x149   :  { %v3642_v49 = vpop.f32.mrb[35].mxu1  ;;  %2762 = vmatprep.subr.bf16.mxu1 %v4394_v10 }
 0x14a   :  { %v4963_v34 = vadd.f32 %v3640_v45, %v2017_v30  ;;  %v3643_v51 = vadd.f32 %v3642_v49, %v3641_v46  ;;  %v2052_v49 = vadd.f32 %v4885_v62, %v4941_v31  ;;  %v4407_v62 = vld [vmem:[%s5383_s3 + $0xf0] ss:$8 sps:$4 sm:$0xff]  }
 0x14b   :  { %1972 = vmatmul.mubr.bf16.gmra.mrb[28].mxu0 %v4860_v32 }
 0x14c   :  { %v4968_v54 = vadd.f32 %v3643_v51, %v2020_v43  ;;  %2763 = vmatpush1.bf16.msra.mxu1 %v4392_v15  ;;  %v2049_v43 = vadd.f32 %v4883_v59, %v4941_v31 }
 0x14d   :  { %2764 = vmatprep.subr.bf16.mxu1 %v4397_v20 }
 0x14f   :  { %v3644_v57 = vpop.f32.mrb[36].mxu1 }
 0x150   :  { %v3645_v32 = vpop.f32.mrb[37].mxu1  ;;  %2765 = vmatpush1.bf16.msra.mxu1 %v4395_v50  ;;  %v2073_v50 = vadd.f32 %v4934_v26, %v4941_v31 }
 0x151   :  { %v3646_v61 = vadd.f32 %v3645_v32, %v3644_v57  ;;  %v3647_v63 = vpop.f32.mrb[38].mxu1  ;;  %2766 = vmatprep.subr.bf16.mxu1 %v4400_v27  ;;  %v4409_v32 = vld [vmem:[%s5383_s3 + $0xf4] ss:$8 sps:$4 sm:$0xff]  }
 0x152   :  { %v3648_v1 = vpop.f32.mrb[39].mxu1 }
 0x153   :  { %v4983_v3 = vadd.f32 %v3646_v61, %v2025_v55  ;;  %v3649_v41 = vadd.f32 %v3648_v1, %v3647_v63 }
 0x154   :  { %2767 = vmatpush1.bf16.msra.mxu1 %v4398_v36 }
 0x155   :  { %v4988_v5 = vadd.f32 %v3649_v41, %v2028_v60  ;;  %2768 = vmatprep.subr.bf16.mxu1 %v4403_v40  ;;  %v2057_v60 = vadd.f32 %v4891_v2, %v4941_v31  ;;  %v2065_v2 = vadd.f32 %v4908_v13, %v4941_v31  ;;  %v2076_v13 = vadd.f32 %v4943_v33, %v4941_v31 }
 0x157   :  { %v3650_v8 = vpop.f32.mrb[40].mxu1 }
 0x158   :  { %v3651_v9 = vpop.f32.mrb[41].mxu1  ;;  %2769 = vmatpush1.bf16.msra.mxu1 %v4401_v56 }
 0x159   :  { %v3652_v12 = vadd.f32 %v3651_v9, %v3650_v8  ;;  %v3653_v14 = vpop.f32.mrb[42].mxu1  ;;  %2770 = vmatprep.subr.bf16.mxu1 %v4406_v48  ;;  %v4412_v9 = vld [vmem:[%s5383_s3 + $0x104] ss:$8 sps:$4 sm:$0xff]  }
 0x15a   :  { %v3654_v16 = vpop.f32.mrb[43].mxu1 }
 0x15b   :  { %v5003_v19 = vadd.f32 %v3652_v12, %v2033_v7  ;;  %v3655_v47 = vadd.f32 %v3654_v16, %v3653_v14 }
 0x15c   :  { %2771 = vmatpush1.bf16.msra.mxu1 %v4404_v37 }
 0x15d   :  { %v5008_v21 = vadd.f32 %v3655_v47, %v2036_v11  ;;  %2772 = vmatprep.subr.bf16.mxu1 %v4409_v32 }
 0x15f   :  { %v3656_v24 = vpop.f32.mrb[44].mxu1 }
 0x160   :  { %v3657_v25 = vpop.f32.mrb[45].mxu1  ;;  %2773 = vmatpush1.bf16.msra.mxu1 %v4407_v62 }
 0x161   :  { %v3658_v29 = vadd.f32 %v3657_v25, %v3656_v24  ;;  %v3659_v35 = vpop.f32.mrb[46].mxu1  ;;  %2855 = vmatprep.subr.bf16.mxu1 %v4412_v9 }
 0x162   :  { %v3660_v30 = vpop.f32.mrb[47].mxu1 }
 0x163   :  { %v5023_v39 = vadd.f32 %v3658_v29, %v2041_v22  ;;  %v3661_v53 = vadd.f32 %v3660_v30, %v3659_v35 }
 0x165   :  { %v5028_v42 = vadd.f32 %v3661_v53, %v2044_v28 }
 0x167   :  { %v3662_v45 = vpop.f32.mrb[48].mxu1 }
 0x168   :  { %v3663_v46 = vpop.f32.mrb[49].mxu1 }
 0x169   :  { %v3664_v51 = vadd.f32 %v3663_v46, %v3662_v45  ;;  %v3665_v52 = vpop.f32.mrb[50].mxu1 }
 0x16a   :  { %v3666_v55 = vpop.f32.mrb[51].mxu1 }
 0x16b   :  { %v5043_v57 = vadd.f32 %v3664_v51, %v2049_v43  ;;  %v3667_v59 = vadd.f32 %v3666_v55, %v3665_v52 }
 0x16d   :  { %v5048_v58 = vadd.f32 %v3667_v59, %v2052_v49 }
 0x16f   :  { %v3668_v61 = vpop.f32.mrb[52].mxu1 }
 0x170   :  { %v3669_v63 = vpop.f32.mrb[53].mxu1 }
 0x171   :  { %v3670_v1 = vadd.f32 %v3669_v63, %v3668_v61  ;;  %v3671_v41 = vpop.f32.mrb[54].mxu1 }
 0x172   :  { %v3672_v4 = vpop.f32.mrb[55].mxu1 }
 0x173   :  { %v5057_v44 = vadd.f32 %v3670_v1, %v2057_v60  ;;  %v3673_v7 = vadd.f32 %v3672_v4, %v3671_v41 }
 0x175   :  { %v5059_v8 = vadd.f32 %v3673_v7, %v2060_v0 }
 0x177   :  { %v3674_v10 = vpop.f32.mrb[56].mxu1 }
 0x178   :  { %v3675_v11 = vpop.f32.mrb[57].mxu1 }
 0x179   :  { %v3676_v12 = vadd.f32 %v3675_v11, %v3674_v10  ;;  %v3677_v14 = vpop.f32.mrb[58].mxu1 }
 0x17a   :  { %v3678_v15 = vpop.f32.mrb[59].mxu1 }
 0x17b   :  { %v5068_v16 = vadd.f32 %v3676_v12, %v2065_v2  ;;  %v3679_v47 = vadd.f32 %v3678_v15, %v3677_v14 }
 0x17d   :  { %v5070_v20 = vadd.f32 %v3679_v47, %v2068_v6 }
 0x17f   :  { %v3680_v22 = vpop.f32.mrb[60].mxu1 }
 0x180   :  { %v3681_v24 = vpop.f32.mrb[61].mxu1 }
 0x181   :  { %v3682_v25 = vadd.f32 %v3681_v24, %v3680_v22  ;;  %v3683_v27 = vpop.f32.mrb[62].mxu1 }
 0x182   :  { %v3684_v28 = vpop.f32.mrb[63].mxu1 }
 0x183   :  { %v5076_v18 = vadd.f32 %v3682_v25, %v2073_v50  ;;  %v3685_v29 = vadd.f32 %v3684_v28, %v3683_v27 }
 0x185   :  { %v5078_v35 = vadd.f32 %v3685_v29, %v2076_v13 }
 0x187   :  { %v3702_v36 = vpop.f32.mrb[64].mxu1 }
 0x188   :  { %v3703_v30 = vpop.f32.mrb[65].mxu1 }
 0x189   :  { %v3704_v53 = vadd.f32 %v3703_v30, %v3702_v36  ;;  %v3705_v40 = vpop.f32.mrb[66].mxu1 }
 0x18a   :  { %v3706_v56 = vpop.f32.mrb[67].mxu1 }
 0x18b   :  { %v3707_v43 = vadd.f32 %v3706_v56, %v3705_v40  ;;  %v2211_v26 = vadd.f32 %v3704_v53, %v4963_v34 }
 0x18d   :  { %v5082_v45 = vadd.f32 %v3707_v43, %v4968_v54 }
 0x18f   :  { %v3708_v31 = vpop.f32.mrb[68].mxu1 }
 0x190   :  { %v3709_v33 = vpop.f32.mrb[69].mxu1 }
 0x191   :  { %v3710_v46 = vadd.f32 %v3709_v33, %v3708_v31  ;;  %v3711_v48 = vpop.f32.mrb[70].mxu1 }
 0x192   :  { %v3712_v49 = vpop.f32.mrb[71].mxu1 }
 0x193   :  { %v3713_v51 = vadd.f32 %v3712_v49, %v3711_v48  ;;  %v2219_v52 = vadd.f32 %v3710_v46, %v4983_v3 }
 0x195   :  { %v2222_v37 = vadd.f32 %v3713_v51, %v4988_v5 }
 0x197   :  { %v3714_v55 = vpop.f32.mrb[72].mxu1 }
 0x198   :  { %v3715_v59 = vpop.f32.mrb[73].mxu1 }
 0x199   :  { %v3716_v32 = vadd.f32 %v3715_v59, %v3714_v55  ;;  %v3717_v62 = vpop.f32.mrb[74].mxu1 }
 0x19a   :  { %v3718_v60 = vpop.f32.mrb[75].mxu1 }
 0x19b   :  { %v3719_v61 = vadd.f32 %v3718_v60, %v3717_v62  ;;  %v2227_v34 = vadd.f32 %v3716_v32, %v5003_v19 }
 0x19d   :  { %v2230_v54 = vadd.f32 %v3719_v61, %v5008_v21 }
 0x19f   :  { %v3720_v63 = vpop.f32.mrb[76].mxu1 }
 0x1a0   :  { %v3721_v0 = vpop.f32.mrb[77].mxu1 }
 0x1a1   :  { %v3722_v1 = vadd.f32 %v3721_v0, %v3720_v63  ;;  %v3723_v41 = vpop.f32.mrb[78].mxu1 }
 0x1a2   :  { %v3724_v4 = vpop.f32.mrb[79].mxu1 }
 0x1a3   :  { %v3725_v7 = vadd.f32 %v3724_v4, %v3723_v41  ;;  %v2235_v3 = vadd.f32 %v3722_v1, %v5023_v39 }
 0x1a5   :  { %v2238_v5 = vadd.f32 %v3725_v7, %v5028_v42 }
 0x1a7   :  { %v3726_v9 = vpop.f32.mrb[80].mxu1 }
 0x1a8   :  { %v3727_v2 = vpop.f32.mrb[81].mxu1 }
 0x1a9   :  { %v3728_v10 = vadd.f32 %v3727_v2, %v3726_v9  ;;  %v3729_v11 = vpop.f32.mrb[82].mxu1 }
 0x1aa   :  { %v3730_v6 = vpop.f32.mrb[83].mxu1 }
 0x1ab   :  { %v3731_v12 = vadd.f32 %v3730_v6, %v3729_v11  ;;  %v2243_v19 = vadd.f32 %v3728_v10, %v5043_v57 }
 0x1ad   :  { %v2246_v21 = vadd.f32 %v3731_v12, %v5048_v58 }
 0x1af   :  { %v3732_v14 = vpop.f32.mrb[84].mxu1 }
 0x1b0   :  { %v3733_v15 = vpop.f32.mrb[85].mxu1 }
 0x1b1   :  { %v3734_v47 = vadd.f32 %v3733_v15, %v3732_v14  ;;  %v3735_v50 = vpop.f32.mrb[86].mxu1 }
 0x1b2   :  { %v3736_v22 = vpop.f32.mrb[87].mxu1 }
 0x1b3   :  { %v3737_v24 = vadd.f32 %v3736_v22, %v3735_v50  ;;  %v2251_v39 = vadd.f32 %v3734_v47, %v5057_v44 }
 0x1b5   :  { %v2254_v42 = vadd.f32 %v3737_v24, %v5059_v8 }
 0x1b7   :  { %v3738_v13 = vpop.f32.mrb[88].mxu1 }
 0x1b8   :  { %v3739_v25 = vpop.f32.mrb[89].mxu1 }
 0x1b9   :  { %v3740_v27 = vadd.f32 %v3739_v25, %v3738_v13  ;;  %v3741_v28 = vpop.f32.mrb[90].mxu1 }
 0x1ba   :  { %v3742_v29 = vpop.f32.mrb[91].mxu1 }
 0x1bb   :  { %v3743_v36 = vadd.f32 %v3742_v29, %v3741_v28  ;;  %v2259_v57 = vadd.f32 %v3740_v27, %v5068_v16  ;;  %v333_v27 = vsub.s32 0, %v4914_v17 }
 0x1bd   :  { %v2262_v58 = vadd.f32 %v3743_v36, %v5070_v20 }
 0x1bf   :  { %v3744_v30 = vpop.f32.mrb[92].mxu1 }
 0x1c0   :  { %v3745_v53 = vpop.f32.mrb[93].mxu1 }
 0x1c1   :  { %v3746_v40 = vadd.f32 %v3745_v53, %v3744_v30  ;;  %v3747_v56 = vpop.f32.mrb[94].mxu1  ;;  %v5116_v53 = vrot.slane %v4929_v23, %v333_v27 }
 0x1c2   :  { %v3748_v43 = vpop.f32.mrb[95].mxu1 }
 0x1c3   :  { %v3749_v31 = vadd.f32 %v3748_v43, %v3747_v56  ;;  %v2267_v44 = vadd.f32 %v3746_v40, %v5076_v18 }
 0x1c5   :  { %v2270_v8 = vadd.f32 %v3749_v31, %v5078_v35 }
 0x1c7   :  { %v3848_v33 = vpop.f32.mrb[96].mxu1 }
 0x1c8   :  { %v2316_v46 = vadd.f32 %v3848_v33, %v2219_v52  ;;  %v2307_v48 = vpop.f32.mrb[97].mxu1 }
 0x1c9   :  { %v2308_v49 = vadd.f32 %v2307_v48, %v2211_v26  ;;  %v3849_v51 = vpop.f32.mrb[98].mxu1 }
 0x1ca   :  { %v2319_v55 = vadd.f32 %v3849_v51, %v2222_v37  ;;  %v2310_v59 = vpop.f32.mrb[99].mxu1  ;;  %v2378_v20 = vmax.f32 %v2316_v46, 0.0 }
 0x1cb   :  { %v2311_v16 = vadd.f32 %v2310_v59, %v5082_v45  ;;  %v2372_v62 = vmax.f32 %v2308_v49, 0.0  ;;  %v4435_v59 = vld [vmem:[%s5385_s5] sm:$0xff]  }
 0x1cc   :  { %v2381_v32 = vmax.f32 %v2319_v55, 0.0 }
 0x1cd   :  { %v2375_v60 = vmax.f32 %v2311_v16, 0.0  ;;  %v4436_v16 = vld [vmem:[%s5385_s5 + $0x48] sm:$0xff]  }
 0x1ce   :  { %v5099_v61 = vpack.c.bf16 %v2381_v32, %v2378_v20 }
 0x1cf   :  { %v5101_v63 = vpack.c.bf16 %v2375_v60, %v2372_v62  ;;  %v3852_v18 = vpop.f32.mrb[100].mxu1 }
 0x1d0   :  { %v2332_v0 = vadd.f32 %v3852_v18, %v2235_v3  ;;  %v2323_v35 = vpop.f32.mrb[101].mxu1 }
 0x1d1   :  { %v2324_v1 = vadd.f32 %v2323_v35, %v2227_v34  ;;  %v3853_v52 = vpop.f32.mrb[102].mxu1 }
 0x1d2   :  { %v2335_v41 = vadd.f32 %v3853_v52, %v2238_v5  ;;  %v2326_v26 = vpop.f32.mrb[103].mxu1  ;;  %v2390_v37 = vmax.f32 %v2332_v0, 0.0  ;;  %v4437_v0 = vld [vmem:[%s5385_s5 + $0x8] sm:$0xff]  }
 0x1d3   :  { %v2327_v4 = vadd.f32 %v2326_v26, %v2230_v54  ;;  %v2384_v9 = vmax.f32 %v2324_v1, 0.0  ;;  %v4438_v1 = vld [vmem:[%s5385_s5 + $0x50] sm:$0xff]   ;;  %v4410_v26 = vld [vmem:[%s5383_s3 + $0x100] ss:$8 sps:$4 sm:$0xff]  }
 0x1d4   :  { %v2393_v7 = vmax.f32 %v2335_v41, 0.0 }
 0x1d5   :  { %v2387_v45 = vmax.f32 %v2327_v4, 0.0 }
 0x1d6   :  { %v5103_v2 = vpack.c.bf16 %v2393_v7, %v2390_v37  ;;  %v4415_v7 = vld [vmem:[%s5383_s3 + $0x114] ss:$8 sps:$4 sm:$0xff]  }
 0x1d7   :  { %v5105_v10 = vpack.c.bf16 %v2387_v45, %v2384_v9  ;;  %v3856_v11 = vpop.f32.mrb[104].mxu1 }
 0x1d8   :  { %v2348_v6 = vadd.f32 %v3856_v11, %v2251_v39  ;;  %v2339_v12 = vpop.f32.mrb[105].mxu1  ;;  %v337_v39 = vsub.s32 1, %v4914_v17  ;;  %v4439_v11 = vld [vmem:[%s5385_s5 + $0x10] sm:$0xff]  }
 0x1d9   :  { %v2340_v14 = vadd.f32 %v2339_v12, %v2243_v19  ;;  %v3857_v15 = vpop.f32.mrb[106].mxu1 }
 0x1da   :  { %v2351_v3 = vadd.f32 %v3857_v15, %v2254_v42  ;;  %v2342_v47 = vpop.f32.mrb[107].mxu1  ;;  %v2402_v50 = vmax.f32 %v2348_v6, 0.0  ;;  %v5121_v43 = vrot.slane %v4929_v23, %v337_v39  ;;  %v4434_v23 = vld [vmem:[%s5385_s5 + $0x40] sm:$0xff]  }
 0x1db   :  { %v2343_v34 = vadd.f32 %v2342_v47, %v2246_v21  ;;  %v2396_v22 = vmax.f32 %v2340_v14, 0.0  ;;  %3766 = vmatprep.subr.bf16.mxu0 %v4434_v23  ;;  %v4440_v14 = vld [vmem:[%s5385_s5 + $0x58] sm:$0xff]  }
 0x1dc   :  { %v2405_v5 = vmax.f32 %v2351_v3, 0.0  ;;  %3767 = vmatpush3.bf16.msra.mxu0 %v4435_v59  ;;  %v4413_v3 = vld [vmem:[%s5383_s3 + $0x110] ss:$8 sps:$4 sm:$0xff]  }
 0x1dd   :  { %v2399_v54 = vmax.f32 %v2343_v34, 0.0  ;;  %3768 = vmatprep.subr.bf16.mxu0 %v4436_v16  ;;  %v4445_v16 = vld [vmem:[%s5385_s5 + $0x28] sm:$0xff]  }
 0x1de   :  { %v5107_v24 = vpack.c.bf16 %v2405_v5, %v2402_v50  ;;  %v4418_v50 = vld [vmem:[%s5383_s3 + $0x124] ss:$8 sps:$4 sm:$0xff]  }
 0x1df   :  { %v5109_v13 = vpack.c.bf16 %v2399_v54, %v2396_v22  ;;  %v3860_v25 = vpop.f32.mrb[108].mxu1  ;;  %v4441_v54 = vld [vmem:[%s5385_s5 + $0x18] sm:$0xff]  }
 0x1e0   :  { %v2364_v28 = vadd.f32 %v3860_v25, %v2267_v44  ;;  %v2355_v29 = vpop.f32.mrb[109].mxu1  ;;  %3769 = vmatpush3.bf16.msra.mxu0 %v4437_v0 }
 0x1e1   :  { %v2356_v19 = vadd.f32 %v2355_v29, %v2259_v57  ;;  %v3861_v36 = vpop.f32.mrb[110].mxu1  ;;  %3770 = vmatprep.subr.bf16.mxu0 %v4438_v1  ;;  %v4427_v1 = vld [vmem:[%s5383_s3 + $0x154] ss:$8 sps:$4 sm:$0xff]  }
 0x1e2   :  { %v2367_v42 = vadd.f32 %v3861_v36, %v2270_v8  ;;  %v2358_v30 = vpop.f32.mrb[111].mxu1  ;;  %v2414_v40 = vmax.f32 %v2364_v28, 0.0  ;;  %v4442_v28 = vld [vmem:[%s5385_s5 + $0x60] sm:$0xff]  }
 0x1e3   :  { %v2359_v21 = vadd.f32 %v2358_v30, %v2262_v58  ;;  %v2408_v31 = vmax.f32 %v2356_v19, 0.0  ;;  %v4416_v36 = vld [vmem:[%s5383_s3 + $0x120] ss:$8 sps:$4 sm:$0xff]  }
 0x1e4   :  { %v2417_v56 = vmax.f32 %v2367_v42, 0.0  ;;  %3771 = vmatpush3.bf16.msra.mxu0 %v4439_v11 }
 0x1e5   :  { %v2411_v44 = vmax.f32 %v2359_v21, 0.0  ;;  %3772 = vmatprep.subr.bf16.mxu0 %v4440_v14  ;;  %v4421_v21 = vld [vmem:[%s5383_s3 + $0x134] ss:$8 sps:$4 sm:$0xff]  }
 0x1e6   :  { %v5123_v33 = vpack.c.bf16 %v2417_v56, %v2414_v40  ;;  %v1903_v57 = vpop.f32.mrb[0].mxu0 }
 0x1e7   :  { %v5125_v8 = vpack.c.bf16 %v2411_v44, %v2408_v31  ;;  %v3862_v58 = vadd.f32 %v1903_v57, %v5116_v53  ;;  %v1905_v46 = vpop.f32.mrb[1].mxu0  ;;  %v4443_v31 = vld [vmem:[%s5385_s5 + $0x20] sm:$0xff]  }
 0x1e8   :  { %v3863_v48 = vadd.f32 %v1905_v46, %v5121_v43  ;;  %v1907_v49 = vpop.f32.mrb[2].mxu0  ;;  %3773 = vmatpush3.bf16.msra.mxu0 %v4441_v54 }
 0x1e9   :  { %v3864_v51 = vadd.f32 %v1907_v49, %v5116_v53  ;;  %v1909_v55 = vpop.f32.mrb[3].mxu0  ;;  %v2370_v32 = vmax.f32 %v3862_v58, 0.0  ;;  %3774 = vmatprep.subr.bf16.mxu0 %v4442_v28  ;;  %v4444_v58 = vld [vmem:[%s5385_s5 + $0x68] sm:$0xff]  }
 0x1ea   :  { %v3865_v20 = vadd.f32 %v1909_v55, %v5121_v43  ;;  %v2371_v60 = vmax.f32 %v3863_v48, 0.0  ;;  %v4419_v48 = vld [vmem:[%s5383_s3 + $0x130] ss:$8 sps:$4 sm:$0xff]   ;;  %v4424_v55 = vld [vmem:[%s5383_s3 + $0x144] ss:$8 sps:$4 sm:$0xff]  }
 0x1eb   :  { %v2373_v62 = vmax.f32 %v3864_v51, 0.0 }
 0x1ec   :  { %v2374_v18 = vmax.f32 %v3865_v20, 0.0  ;;  %3775 = vmatpush3.bf16.msra.mxu0 %v4443_v31 }
 0x1ed   :  { %v2418_v35 = vpack.c.bf16 %v2373_v62, %v2370_v32  ;;  %3776 = vmatprep.subr.bf16.mxu0 %v4444_v58  ;;  %v4446_v32 = vld [vmem:[%s5385_s5 + $0x70] sm:$0xff]  }
 0x1ee   :  { %v2419_v52 = vpack.c.bf16 %v2374_v18, %v2371_v60  ;;  %v1913_v41 = vpop.f32.mrb[4].mxu0  ;;  %v4422_v18 = vld [vmem:[%s5383_s3 + $0x140] ss:$8 sps:$4 sm:$0xff]  }
 0x1ef   :  { %v3866_v4 = vadd.f32 %v1913_v41, %v5116_v53  ;;  %v1915_v37 = vpop.f32.mrb[5].mxu0 }
 0x1f0   :  { %v3867_v9 = vadd.f32 %v1915_v37, %v5121_v43  ;;  %v1917_v45 = vpop.f32.mrb[6].mxu0  ;;  %2774 = vmatprep.mubr.bf16.mxu1 %v2419_v52  ;;  %3777 = vmatpush3.bf16.msra.mxu0 %v4445_v16 }
 0x1f1   :  { %v3868_v6 = vadd.f32 %v1917_v45, %v5116_v53  ;;  %v1919_v12 = vpop.f32.mrb[7].mxu0  ;;  %2775 = vmatmul.mubr.bf16.vlgmr.msra.gmra.mrb[112].mxu1 %v2418_v35  ;;  %v2376_v47 = vmax.f32 %v3866_v4, 0.0  ;;  %3778 = vmatprep.subr.bf16.mxu0 %v4446_v32 }
 0x1f2   :  { %v3869_v15 = vadd.f32 %v1919_v12, %v5121_v43  ;;  %2856 = vmatpush1.bf16.msra.mxu1 %v4410_v26  ;;  %v2377_v5 = vmax.f32 %v3867_v9, 0.0  ;;  %v4447_v26 = vld [vmem:[%s5385_s5 + $0x30] sm:$0xff]  }
 0x1f3   :  { %v2379_v34 = vmax.f32 %v3868_v6, 0.0  ;;  %2857 = vmatprep.subr.bf16.mxu1 %v4415_v7  ;;  %v4425_v9 = vld [vmem:[%s5383_s3 + $0x150] ss:$8 sps:$4 sm:$0xff]   ;;  %v4430_v6 = vld [vmem:[%s5383_s3 + $0x164] ss:$8 sps:$4 sm:$0xff]  }
 0x1f4   :  { %v2380_v22 = vmax.f32 %v3869_v15, 0.0  ;;  %3779 = vmatpush3.bf16.msra.mxu0 %v4447_v26 }
 0x1f5   :  { %v2421_v25 = vpack.c.bf16 %v2379_v34, %v2376_v47  ;;  %v4428_v34 = vld [vmem:[%s5383_s3 + $0x160] ss:$8 sps:$4 sm:$0xff]  }
 0x1f6   :  { %v2422_v29 = vpack.c.bf16 %v2380_v22, %v2377_v5  ;;  %v1923_v19 = vpop.f32.mrb[8].mxu0  ;;  %2858 = vmatpush1.bf16.msra.mxu1 %v4413_v3  ;;  %v4433_v22 = vld [vmem:[%s5383_s3 + $0x174] ss:$8 sps:$4 sm:$0xff]  }
 0x1f7   :  { %v3870_v42 = vadd.f32 %v1923_v19, %v5116_v53  ;;  %v1925_v30 = vpop.f32.mrb[9].mxu0  ;;  %2859 = vmatprep.subr.bf16.mxu1 %v4418_v50 }
 0x1f8   :  { %v3871_v40 = vadd.f32 %v1925_v30, %v5121_v43  ;;  %v1927_v56 = vpop.f32.mrb[10].mxu0  ;;  %2784 = vmatprep.mubr.bf16.mxu1 %v2422_v29 }
 0x1f9   :  { %v3872_v44 = vadd.f32 %v1927_v56, %v5116_v53  ;;  %v1929_v57 = vpop.f32.mrb[11].mxu0  ;;  %2785 = vmatmul.mubr.bf16.gmra.mrb[116].mxu1 %v2421_v25  ;;  %v2382_v49 = vmax.f32 %v3870_v42, 0.0 }
 0x1fa   :  { %v3873_v46 = vadd.f32 %v1929_v57, %v5121_v43  ;;  %2860 = vmatpush1.bf16.msra.mxu1 %v4416_v36  ;;  %v2383_v23 = vmax.f32 %v3871_v40, 0.0  ;;  %v4431_v36 = vld [vmem:[%s5383_s3 + $0x170] ss:$8 sps:$4 sm:$0xff]  }
 0x1fb   :  { %v2385_v51 = vmax.f32 %v3872_v44, 0.0  ;;  %2861 = vmatprep.subr.bf16.mxu1 %v4421_v21 }
 0x1fc   :  { %v2386_v59 = vmax.f32 %v3873_v46, 0.0 }
 0x1fd   :  { %v2424_v20 = vpack.c.bf16 %v2385_v51, %v2382_v49 }
 0x1fe   :  { %v2425_v62 = vpack.c.bf16 %v2386_v59, %v2383_v23  ;;  %v1933_v60 = vpop.f32.mrb[12].mxu0  ;;  %2862 = vmatpush1.bf16.msra.mxu1 %v4419_v48 }
 0x1ff   :  { %v3874_v0 = vadd.f32 %v1933_v60, %v5116_v53  ;;  %v1935_v35 = vpop.f32.mrb[13].mxu0  ;;  %2863 = vmatprep.subr.bf16.mxu1 %v4424_v55 }
 0x200   :  { %v3875_v52 = vadd.f32 %v1935_v35, %v5121_v43  ;;  %v1937_v41 = vpop.f32.mrb[14].mxu0  ;;  %2794 = vmatprep.mubr.bf16.mxu1 %v2425_v62 }
 0x201   :  { %v3876_v4 = vadd.f32 %v1937_v41, %v5116_v53  ;;  %v1939_v37 = vpop.f32.mrb[15].mxu0  ;;  %2795 = vmatmul.mubr.bf16.gmra.mrb[120].mxu1 %v2424_v20  ;;  %v2388_v45 = vmax.f32 %v3874_v0, 0.0 }
 0x202   :  { %v3877_v7 = vadd.f32 %v1939_v37, %v5121_v43  ;;  %2864 = vmatpush1.bf16.msra.mxu1 %v4422_v18  ;;  %v2389_v12 = vmax.f32 %v3875_v52, 0.0 }
 0x203   :  { %v2391_v11 = vmax.f32 %v3876_v4, 0.0  ;;  %2865 = vmatprep.subr.bf16.mxu1 %v4427_v1 }
 0x204   :  { %v2392_v14 = vmax.f32 %v3877_v7, 0.0 }
 0x205   :  { %v2427_v15 = vpack.c.bf16 %v2391_v11, %v2388_v45 }
 0x206   :  { %v2428_v3 = vpack.c.bf16 %v2392_v14, %v2389_v12  ;;  %v1943_v47 = vpop.f32.mrb[16].mxu0  ;;  %2866 = vmatpush1.bf16.msra.mxu1 %v4425_v9 }
 0x207   :  { %v3878_v50 = vadd.f32 %v1943_v47, %v5116_v53  ;;  %v1945_v5 = vpop.f32.mrb[17].mxu0  ;;  %2867 = vmatprep.subr.bf16.mxu1 %v4430_v6 }
 0x208   :  { %v3879_v54 = vadd.f32 %v1945_v5, %v5121_v43  ;;  %v1947_v25 = vpop.f32.mrb[18].mxu0  ;;  %2804 = vmatprep.mubr.bf16.mxu1 %v2428_v3 }
 0x209   :  { %v3880_v28 = vadd.f32 %v1947_v25, %v5116_v53  ;;  %v1949_v29 = vpop.f32.mrb[19].mxu0  ;;  %2805 = vmatmul.mubr.bf16.gmra.mrb[124].mxu1 %v2427_v15  ;;  %v2394_v42 = vmax.f32 %v3878_v50, 0.0 }
 0x20a   :  { %v3881_v19 = vadd.f32 %v1949_v29, %v5121_v43  ;;  %2868 = vmatpush1.bf16.msra.mxu1 %v4428_v34  ;;  %v2395_v21 = vmax.f32 %v3879_v54, 0.0 }
 0x20b   :  { %v2397_v30 = vmax.f32 %v3880_v28, 0.0  ;;  %2869 = vmatprep.subr.bf16.mxu1 %v4433_v22 }
 0x20c   :  { %v2398_v40 = vmax.f32 %v3881_v19, 0.0 }
 0x20d   :  { %v2430_v56 = vpack.c.bf16 %v2397_v30, %v2394_v42 }
 0x20e   :  { %v2431_v31 = vpack.c.bf16 %v2398_v40, %v2395_v21  ;;  %v1953_v44 = vpop.f32.mrb[20].mxu0  ;;  %2870 = vmatpush1.bf16.msra.mxu1 %v4431_v36 }
 0x20f   :  { %v3882_v57 = vadd.f32 %v1953_v44, %v5116_v53  ;;  %v1955_v58 = vpop.f32.mrb[21].mxu0 }
 0x210   :  { %v3883_v46 = vadd.f32 %v1955_v58, %v5121_v43  ;;  %v1957_v48 = vpop.f32.mrb[22].mxu0  ;;  %2814 = vmatprep.mubr.bf16.mxu1 %v2431_v31 }
 0x211   :  { %v3884_v49 = vadd.f32 %v1957_v48, %v5116_v53  ;;  %v1959_v51 = vpop.f32.mrb[23].mxu0  ;;  %2815 = vmatmul.mubr.bf16.gmra.mrb[128].mxu1 %v2430_v56  ;;  %v2400_v23 = vmax.f32 %v3882_v57, 0.0 }
 0x212   :  { %v3885_v55 = vadd.f32 %v1959_v51, %v5121_v43  ;;  %v2401_v16 = vmax.f32 %v3883_v46, 0.0 }
 0x213   :  { %v2403_v59 = vmax.f32 %v3884_v49, 0.0 }
 0x214   :  { %v2404_v20 = vmax.f32 %v3885_v55, 0.0 }
 0x215   :  { %v2433_v32 = vpack.c.bf16 %v2403_v59, %v2400_v23 }
 0x216   :  { %v2434_v62 = vpack.c.bf16 %v2404_v20, %v2401_v16  ;;  %v1963_v60 = vpop.f32.mrb[24].mxu0 }
 0x217   :  { %v3886_v18 = vadd.f32 %v1963_v60, %v5116_v53  ;;  %v1965_v0 = vpop.f32.mrb[25].mxu0 }
 0x218   :  { %v3887_v35 = vadd.f32 %v1965_v0, %v5121_v43  ;;  %v1967_v1 = vpop.f32.mrb[26].mxu0  ;;  %2824 = vmatprep.mubr.bf16.mxu1 %v2434_v62 }
 0x219   :  { %v3888_v52 = vadd.f32 %v1967_v1, %v5116_v53  ;;  %v1969_v41 = vpop.f32.mrb[27].mxu0  ;;  %2825 = vmatmul.mubr.bf16.gmra.mrb[132].mxu1 %v2433_v32  ;;  %v2406_v4 = vmax.f32 %v3886_v18, 0.0 }
 0x21a   :  { %v3889_v26 = vadd.f32 %v1969_v41, %v5121_v43  ;;  %v2407_v7 = vmax.f32 %v3887_v35, 0.0 }
 0x21b   :  { %v2409_v37 = vmax.f32 %v3888_v52, 0.0 }
 0x21c   :  { %v2410_v9 = vmax.f32 %v3889_v26, 0.0 }
 0x21d   :  { %v2436_v45 = vpack.c.bf16 %v2409_v37, %v2406_v4 }
 0x21e   :  { %v2437_v11 = vpack.c.bf16 %v2410_v9, %v2407_v7  ;;  %v1973_v6 = vpop.f32.mrb[28].mxu0 }
 0x21f   :  { %v3890_v12 = vadd.f32 %v1973_v6, %v5116_v53  ;;  %v1975_v14 = vpop.f32.mrb[29].mxu0 }
 0x220   :  { %v3891_v15 = vadd.f32 %v1975_v14, %v5121_v43  ;;  %v1977_v3 = vpop.f32.mrb[30].mxu0  ;;  %2834 = vmatprep.mubr.bf16.mxu1 %v2437_v11 }
 0x221   :  { %v3892_v47 = vadd.f32 %v1977_v3, %v5116_v53  ;;  %v1979_v34 = vpop.f32.mrb[31].mxu0  ;;  %2835 = vmatmul.mubr.bf16.gmra.mrb[136].mxu1 %v2436_v45  ;;  %v2412_v5 = vmax.f32 %v3890_v12, 0.0 }
 0x222   :  { %v3893_v50 = vadd.f32 %v1979_v34, %v5121_v43  ;;  %v2413_v54 = vmax.f32 %v3891_v15, 0.0 }
 0x223   :  { %v2415_v22 = vmax.f32 %v3892_v47, 0.0 }
 0x224   :  { %v2416_v25 = vmax.f32 %v3893_v50, 0.0 }
 0x225   :  { %v2439_v28 = vpack.c.bf16 %v2415_v22, %v2412_v5 }
 0x226   :  { %v2440_v29 = vpack.c.bf16 %v2416_v25, %v2413_v54 }
 0x228   :  { %2844 = vmatprep.mubr.bf16.mxu1 %v2440_v29 }
 0x229   :  { %2845 = vmatmul.mubr.bf16.gmra.mrb[140].mxu1 %v2439_v28 }
 0x22a   :  { %2887 = vmatprep.mubr.bf16.mxu1 %v4477_v38 }
 0x231   :  { %2888 = vmatmul.mubr.bf16.vlgmr.msra.gmra.mrb[112].mxu1 %v5101_v63  ;;  %v4449_v63 = vld [vmem:[%s5385_s5 + $0x38] sm:$0xff]  }
 0x232   :  { %2897 = vmatprep.mubr.bf16.mxu1 %v4477_v38 }
 0x239   :  { %2898 = vmatmul.mubr.bf16.gmra.mrb[116].mxu1 %v5099_v61  ;;  %v4448_v61 = vld [vmem:[%s5385_s5 + $0x78] sm:$0xff]  }
 0x23a   :  { %2907 = vmatprep.mubr.bf16.mxu1 %v4477_v38  ;;  %3780 = vmatprep.subr.bf16.mxu0 %v4448_v61 }
 0x23b   :  { %3781 = vmatpush3.bf16.msra.mxu0 %v4449_v63 }
 0x241   :  { %2908 = vmatmul.mubr.bf16.gmra.mrb[120].mxu1 %v5105_v10 }
 0x242   :  { %2917 = vmatprep.mubr.bf16.mxu1 %v4477_v38 }
 0x249   :  { %2918 = vmatmul.mubr.bf16.gmra.mrb[124].mxu1 %v5103_v2  ;;  %v2490_v2 = vld [vmem:[%s5384_s4] sm:$0x3] }
 0x24a   :  { %2927 = vmatprep.mubr.bf16.mxu1 %v4477_v38  ;;  %v5273_v10 = vrot.slane %v2490_v2, %v333_v27 }
 0x251   :  { %2928 = vmatmul.mubr.bf16.gmra.mrb[128].mxu1 %v5109_v13 }
 0x252   :  { %2937 = vmatprep.mubr.bf16.mxu1 %v4477_v38 }
 0x259   :  { %2938 = vmatmul.mubr.bf16.gmra.mrb[132].mxu1 %v5107_v24 }
 0x25a   :  { %2947 = vmatprep.mubr.bf16.mxu1 %v4477_v38 }
 0x261   :  { %2948 = vmatmul.mubr.bf16.gmra.mrb[136].mxu1 %v5125_v8 }
 0x262   :  { %2957 = vmatprep.mubr.bf16.mxu1 %v4477_v38  ;;  %v5277_v38 = vrot.slane %v2490_v2, %v337_v39 }
 0x269   :  { %2958 = vmatmul.mubr.bf16.gmra.mrb[140].mxu1 %v5123_v33 }
 0x304   :  { %v2889_v24 = vpop.f32.mrb[112].mxu1 }
 0x305   :  { %v3894_v13 = vadd.f32 %v2889_v24, %v5273_v10  ;;  %v2891_v53 = vpop.f32.mrb[113].mxu1 }
 0x306   :  { %v3895_v43 = vadd.f32 %v2891_v53, %v5277_v38  ;;  %v2893_v33 = vpop.f32.mrb[114].mxu1 }
 0x307   :  { %v3896_v8 = vadd.f32 %v2893_v33, %v5273_v10  ;;  %v2895_v19 = vpop.f32.mrb[115].mxu1  ;;  %v2968_v42 = vmax.f32 %v3894_v13, 0.0 }
 0x308   :  { %v3897_v36 = vadd.f32 %v2895_v19, %v5277_v38  ;;  %v2969_v27 = vmax.f32 %v3895_v43, 0.0 }
 0x309   :  { %v2970_v30 = vmax.f32 %v3896_v8, 0.0 }
 0x30a   :  { %v2971_v21 = vmax.f32 %v3897_v36, 0.0 }
 0x30b   :  { %v3000_v40 = vpack.c.bf16 %v2970_v30, %v2968_v42 }
 0x30c   :  { %v3001_v17 = vpack.c.bf16 %v2971_v21, %v2969_v27  ;;  %v2899_v39 = vpop.f32.mrb[116].mxu1 }
 0x30d   :  { %v3898_v56 = vadd.f32 %v2899_v39, %v5273_v10  ;;  %v2901_v31 = vpop.f32.mrb[117].mxu1 }
 0x30e   :  { %v3899_v44 = vadd.f32 %v2901_v31, %v5277_v38  ;;  %v2903_v57 = vpop.f32.mrb[118].mxu1  ;;  %3183 = vmatprep.mubr.bf16.mxu0 %v3001_v17 }
 0x30f   :  { %v3900_v58 = vadd.f32 %v2903_v57, %v5273_v10  ;;  %v2905_v46 = vpop.f32.mrb[119].mxu1  ;;  %3184 = vmatmul.mubr.bf16.vlgmr.msra.gmra.mrb[32].mxu0 %v3000_v40  ;;  %v2972_v49 = vmax.f32 %v3898_v56, 0.0 }
 0x310   :  { %v3901_v48 = vadd.f32 %v2905_v46, %v5277_v38  ;;  %v2973_v55 = vmax.f32 %v3899_v44, 0.0 }
 0x311   :  { %v2974_v51 = vmax.f32 %v3900_v58, 0.0 }
 0x312   :  { %v2975_v23 = vmax.f32 %v3901_v48, 0.0 }
 0x313   :  { %v3002_v59 = vpack.c.bf16 %v2974_v51, %v2972_v49 }
 0x314   :  { %v3003_v16 = vpack.c.bf16 %v2975_v23, %v2973_v55  ;;  %v2909_v20 = vpop.f32.mrb[120].mxu1 }
 0x315   :  { %v3902_v32 = vadd.f32 %v2909_v20, %v5273_v10  ;;  %v2911_v62 = vpop.f32.mrb[121].mxu1 }
 0x316   :  { %v3903_v60 = vadd.f32 %v2911_v62, %v5277_v38  ;;  %v2913_v18 = vpop.f32.mrb[122].mxu1  ;;  %3191 = vmatprep.mubr.bf16.mxu0 %v3003_v16 }
 0x317   :  { %v3904_v0 = vadd.f32 %v2913_v18, %v5273_v10  ;;  %v2915_v35 = vpop.f32.mrb[123].mxu1  ;;  %3192 = vmatmul.mubr.bf16.gmra.mrb[36].mxu0 %v3002_v59  ;;  %v2976_v52 = vmax.f32 %v3902_v32, 0.0 }
 0x318   :  { %v3905_v1 = vadd.f32 %v2915_v35, %v5277_v38  ;;  %v2977_v26 = vmax.f32 %v3903_v60, 0.0 }
 0x319   :  { %v2978_v41 = vmax.f32 %v3904_v0, 0.0 }
 0x31a   :  { %v2979_v4 = vmax.f32 %v3905_v1, 0.0 }
 0x31b   :  { %v3004_v37 = vpack.c.bf16 %v2978_v41, %v2976_v52 }
 0x31c   :  { %v3005_v7 = vpack.c.bf16 %v2979_v4, %v2977_v26  ;;  %v2919_v9 = vpop.f32.mrb[124].mxu1 }
 0x31d   :  { %v3906_v45 = vadd.f32 %v2919_v9, %v5273_v10  ;;  %v2921_v11 = vpop.f32.mrb[125].mxu1 }
 0x31e   :  { %v3907_v6 = vadd.f32 %v2921_v11, %v5277_v38  ;;  %v2923_v12 = vpop.f32.mrb[126].mxu1  ;;  %3199 = vmatprep.mubr.bf16.mxu0 %v3005_v7 }
 0x31f   :  { %v3908_v14 = vadd.f32 %v2923_v12, %v5273_v10  ;;  %v2925_v15 = vpop.f32.mrb[127].mxu1  ;;  %3200 = vmatmul.mubr.bf16.gmra.mrb[40].mxu0 %v3004_v37  ;;  %v2980_v47 = vmax.f32 %v3906_v45, 0.0 }
 0x320   :  { %v3909_v3 = vadd.f32 %v2925_v15, %v5277_v38  ;;  %v2981_v50 = vmax.f32 %v3907_v6, 0.0 }
 0x321   :  { %v2982_v34 = vmax.f32 %v3908_v14, 0.0 }
 0x322   :  { %v2983_v5 = vmax.f32 %v3909_v3, 0.0 }
 0x323   :  { %v3006_v22 = vpack.c.bf16 %v2982_v34, %v2980_v47  ;;  %v5314_v34 = vld [vmem:[%s5386_s6] ss:$0 sm:$0xff] }
 0x324   :  { %v3007_v54 = vpack.c.bf16 %v2983_v5, %v2981_v50  ;;  %v2929_v25 = vpop.f32.mrb[128].mxu1 }
 0x325   :  { %v3910_v28 = vadd.f32 %v2929_v25, %v5273_v10  ;;  %v2931_v29 = vpop.f32.mrb[129].mxu1 }
 0x326   :  { %v3911_v61 = vadd.f32 %v2931_v29, %v5277_v38  ;;  %v2933_v63 = vpop.f32.mrb[130].mxu1  ;;  %3207 = vmatprep.mubr.bf16.mxu0 %v3007_v54 }
 0x327   :  { %v3912_v2 = vadd.f32 %v2933_v63, %v5273_v10  ;;  %v2935_v24 = vpop.f32.mrb[131].mxu1  ;;  %3208 = vmatmul.mubr.bf16.gmra.mrb[44].mxu0 %v3006_v22  ;;  %v2984_v53 = vmax.f32 %v3910_v28, 0.0 }
 0x328   :  { %v3913_v13 = vadd.f32 %v2935_v24, %v5277_v38  ;;  %v2985_v33 = vmax.f32 %v3911_v61, 0.0 }
 0x329   :  { %v2986_v43 = vmax.f32 %v3912_v2, 0.0 }
 0x32a   :  { %v2987_v8 = vmax.f32 %v3913_v13, 0.0 }
 0x32b   :  { %v3008_v19 = vpack.c.bf16 %v2986_v43, %v2984_v53 }
 0x32c   :  { %v3009_v36 = vpack.c.bf16 %v2987_v8, %v2985_v33  ;;  %v2939_v42 = vpop.f32.mrb[132].mxu1 }
 0x32d   :  { %v3914_v30 = vadd.f32 %v2939_v42, %v5273_v10  ;;  %v2941_v27 = vpop.f32.mrb[133].mxu1 }
 0x32e   :  { %v3915_v21 = vadd.f32 %v2941_v27, %v5277_v38  ;;  %v2943_v40 = vpop.f32.mrb[134].mxu1  ;;  %3215 = vmatprep.mubr.bf16.mxu0 %v3009_v36 }
 0x32f   :  { %v3916_v17 = vadd.f32 %v2943_v40, %v5273_v10  ;;  %v2945_v39 = vpop.f32.mrb[135].mxu1  ;;  %3216 = vmatmul.mubr.bf16.gmra.mrb[48].mxu0 %v3008_v19  ;;  %v2988_v31 = vmax.f32 %v3914_v30, 0.0 }
 0x330   :  { %v3917_v56 = vadd.f32 %v2945_v39, %v5277_v38  ;;  %v2989_v57 = vmax.f32 %v3915_v21, 0.0 }
 0x331   :  { %v2990_v44 = vmax.f32 %v3916_v17, 0.0 }
 0x332   :  { %v2991_v58 = vmax.f32 %v3917_v56, 0.0 }
 0x333   :  { %v3010_v46 = vpack.c.bf16 %v2990_v44, %v2988_v31 }
 0x334   :  { %v3011_v48 = vpack.c.bf16 %v2991_v58, %v2989_v57  ;;  %v2949_v49 = vpop.f32.mrb[136].mxu1 }
 0x335   :  { %v3918_v51 = vadd.f32 %v2949_v49, %v5273_v10  ;;  %v2951_v55 = vpop.f32.mrb[137].mxu1 }
 0x336   :  { %v3919_v23 = vadd.f32 %v2951_v55, %v5277_v38  ;;  %v2953_v59 = vpop.f32.mrb[138].mxu1  ;;  %3223 = vmatprep.mubr.bf16.mxu0 %v3011_v48 }
 0x337   :  { %v3920_v16 = vadd.f32 %v2953_v59, %v5273_v10  ;;  %v2955_v20 = vpop.f32.mrb[139].mxu1  ;;  %3224 = vmatmul.mubr.bf16.gmra.mrb[52].mxu0 %v3010_v46  ;;  %v2992_v62 = vmax.f32 %v3918_v51, 0.0 }
 0x338   :  { %v3921_v32 = vadd.f32 %v2955_v20, %v5277_v38  ;;  %v2993_v18 = vmax.f32 %v3919_v23, 0.0 }
 0x339   :  { %v2994_v60 = vmax.f32 %v3920_v16, 0.0 }
 0x33a   :  { %v2995_v0 = vmax.f32 %v3921_v32, 0.0 }
 0x33b   :  { %v3012_v35 = vpack.c.bf16 %v2994_v60, %v2992_v62 }
 0x33c   :  { %v3013_v1 = vpack.c.bf16 %v2995_v0, %v2993_v18  ;;  %v2959_v52 = vpop.f32.mrb[140].mxu1 }
 0x33d   :  { %v3922_v41 = vadd.f32 %v2959_v52, %v5273_v10  ;;  %v2961_v26 = vpop.f32.mrb[141].mxu1 }
 0x33e   :  { %v3923_v4 = vadd.f32 %v2961_v26, %v5277_v38  ;;  %v2963_v37 = vpop.f32.mrb[142].mxu1  ;;  %3231 = vmatprep.mubr.bf16.mxu0 %v3013_v1 }
 0x33f   :  { %v3924_v7 = vadd.f32 %v2963_v37, %v5273_v10  ;;  %v2965_v9 = vpop.f32.mrb[143].mxu1  ;;  %3232 = vmatmul.mubr.bf16.gmra.mrb[56].mxu0 %v3012_v35  ;;  %v2996_v11 = vmax.f32 %v3922_v41, 0.0 }
 0x340   :  { %v3925_v45 = vadd.f32 %v2965_v9, %v5277_v38  ;;  %v2997_v12 = vmax.f32 %v3923_v4, 0.0 }
 0x341   :  { %v2998_v6 = vmax.f32 %v3924_v7, 0.0 }
 0x342   :  { %v2999_v14 = vmax.f32 %v3925_v45, 0.0 }
 0x343   :  { %v3014_v15 = vpack.c.bf16 %v2998_v6, %v2996_v11 }
 0x344   :  { %v3015_v3 = vpack.c.bf16 %v2999_v14, %v2997_v12 }
 0x346   :  { %3239 = vmatprep.mubr.bf16.mxu0 %v3015_v3 }
 0x347   :  { %3240 = vmatmul.mubr.bf16.gmra.mrb[60].mxu0 %v3014_v15 }
 0x3e2   :  { %v3782_v47 = vpop.f32.mrb[32].mxu0 }
 0x3e3   :  { %v3783_v50 = vpop.f32.mrb[33].mxu0 }
 0x3e4   :  { %v3784_v10 = vadd.f32 %v3783_v50, %v3782_v47  ;;  %v3785_v5 = vpop.f32.mrb[34].mxu0 }
 0x3e5   :  { %v3786_v22 = vpop.f32.mrb[35].mxu0 }
 0x3e6   :  { %v3186_v38 = vadd.f32 %v3784_v10, %v5314_v34  ;;  %v3787_v54 = vadd.f32 %v3786_v22, %v3785_v5 }
 0x3e8   :  { %3248 = vst [vmem:[%s5387_s7] sm:$0xff] %v3186_v38  ;;  %v3189_v25 = vadd.f32 %v3787_v54, %v5314_v34 }
 0x3ea   :  { %3249 = vst [vmem:[%s5387_s7 + $0x8] sm:$0xff] %v3189_v25  ;;  %v3788_v28 = vpop.f32.mrb[36].mxu0 }
 0x3eb   :  { %v3789_v29 = vpop.f32.mrb[37].mxu0 }
 0x3ec   :  { %v3790_v61 = vadd.f32 %v3789_v29, %v3788_v28  ;;  %v3791_v63 = vpop.f32.mrb[38].mxu0 }
 0x3ed   :  { %v3792_v2 = vpop.f32.mrb[39].mxu0 }
 0x3ee   :  { %v3194_v24 = vadd.f32 %v3790_v61, %v5314_v34  ;;  %v3793_v13 = vadd.f32 %v3792_v2, %v3791_v63 }
 0x3f0   :  { %3250 = vst [vmem:[%s5387_s7 + $0x10] sm:$0xff] %v3194_v24  ;;  %v3197_v53 = vadd.f32 %v3793_v13, %v5314_v34 }
 0x3f2   :  { %3251 = vst [vmem:[%s5387_s7 + $0x18] sm:$0xff] %v3197_v53  ;;  %v3794_v43 = vpop.f32.mrb[40].mxu0 }
 0x3f3   :  { %v3795_v33 = vpop.f32.mrb[41].mxu0 }
 0x3f4   :  { %v3796_v8 = vadd.f32 %v3795_v33, %v3794_v43  ;;  %v3797_v19 = vpop.f32.mrb[42].mxu0 }
 0x3f5   :  { %v3798_v36 = vpop.f32.mrb[43].mxu0 }
 0x3f6   :  { %v3202_v42 = vadd.f32 %v3796_v8, %v5314_v34  ;;  %v3799_v30 = vadd.f32 %v3798_v36, %v3797_v19 }
 0x3f8   :  { %3252 = vst [vmem:[%s5387_s7 + $0x20] sm:$0xff] %v3202_v42  ;;  %v3205_v27 = vadd.f32 %v3799_v30, %v5314_v34 }
 0x3fa   :  { %3253 = vst [vmem:[%s5387_s7 + $0x28] sm:$0xff] %v3205_v27  ;;  %v3800_v21 = vpop.f32.mrb[44].mxu0 }
 0x3fb   :  { %v3801_v40 = vpop.f32.mrb[45].mxu0 }
 0x3fc   :  { %v3802_v17 = vadd.f32 %v3801_v40, %v3800_v21  ;;  %v3803_v39 = vpop.f32.mrb[46].mxu0 }
 0x3fd   :  { %v3804_v56 = vpop.f32.mrb[47].mxu0 }
 0x3fe   :  { %v3210_v31 = vadd.f32 %v3802_v17, %v5314_v34  ;;  %v3805_v44 = vadd.f32 %v3804_v56, %v3803_v39 }
 0x400   :  { %3254 = vst [vmem:[%s5387_s7 + $0x30] sm:$0xff] %v3210_v31  ;;  %v3213_v57 = vadd.f32 %v3805_v44, %v5314_v34 }
 0x402   :  { %3255 = vst [vmem:[%s5387_s7 + $0x38] sm:$0xff] %v3213_v57  ;;  %v3806_v58 = vpop.f32.mrb[48].mxu0 }
 0x403   :  { %v3807_v46 = vpop.f32.mrb[49].mxu0 }
 0x404   :  { %v3808_v48 = vadd.f32 %v3807_v46, %v3806_v58  ;;  %v3809_v49 = vpop.f32.mrb[50].mxu0 }
 0x405   :  { %v3810_v51 = vpop.f32.mrb[51].mxu0 }
 0x406   :  { %v3218_v55 = vadd.f32 %v3808_v48, %v5314_v34  ;;  %v3811_v23 = vadd.f32 %v3810_v51, %v3809_v49 }
 0x408   :  { %3256 = vst [vmem:[%s5387_s7 + $0x40] sm:$0xff] %v3218_v55  ;;  %v3221_v59 = vadd.f32 %v3811_v23, %v5314_v34 }
 0x40a   :  { %3257 = vst [vmem:[%s5387_s7 + $0x48] sm:$0xff] %v3221_v59  ;;  %v3812_v16 = vpop.f32.mrb[52].mxu0 }
 0x40b   :  { %v3813_v20 = vpop.f32.mrb[53].mxu0 }
 0x40c   :  { %v3814_v32 = vadd.f32 %v3813_v20, %v3812_v16  ;;  %v3815_v62 = vpop.f32.mrb[54].mxu0 }
 0x40d   :  { %v3816_v60 = vpop.f32.mrb[55].mxu0 }
 0x40e   :  { %v3226_v18 = vadd.f32 %v3814_v32, %v5314_v34  ;;  %v3817_v0 = vadd.f32 %v3816_v60, %v3815_v62 }
 0x410   :  { %3258 = vst [vmem:[%s5387_s7 + $0x50] sm:$0xff] %v3226_v18  ;;  %v3229_v35 = vadd.f32 %v3817_v0, %v5314_v34 }
 0x412   :  { %3259 = vst [vmem:[%s5387_s7 + $0x58] sm:$0xff] %v3229_v35  ;;  %v3818_v1 = vpop.f32.mrb[56].mxu0 }
 0x413   :  { %v3819_v52 = vpop.f32.mrb[57].mxu0 }
 0x414   :  { %v3820_v41 = vadd.f32 %v3819_v52, %v3818_v1  ;;  %v3821_v26 = vpop.f32.mrb[58].mxu0 }
 0x415   :  { %v3822_v4 = vpop.f32.mrb[59].mxu0 }
 0x416   :  { %v3234_v37 = vadd.f32 %v3820_v41, %v5314_v34  ;;  %v3823_v7 = vadd.f32 %v3822_v4, %v3821_v26 }
 0x418   :  { %3260 = vst [vmem:[%s5387_s7 + $0x60] sm:$0xff] %v3234_v37  ;;  %v3237_v9 = vadd.f32 %v3823_v7, %v5314_v34 }
 0x41a   :  { %3261 = vst [vmem:[%s5387_s7 + $0x68] sm:$0xff] %v3237_v9  ;;  %v3824_v45 = vpop.f32.mrb[60].mxu0 }
 0x41b   :  { %v3825_v11 = vpop.f32.mrb[61].mxu0 }
 0x41c   :  { %v3826_v6 = vadd.f32 %v3825_v11, %v3824_v45  ;;  %v3827_v12 = vpop.f32.mrb[62].mxu0 }
 0x41d   :  { %v3828_v14 = vpop.f32.mrb[63].mxu0 }
 0x41e   :  { %v3242_v15 = vadd.f32 %v3826_v6, %v5314_v34  ;;  %v3829_v3 = vadd.f32 %v3828_v14, %v3827_v12 }
 0x420   :  { %3262 = vst [vmem:[%s5387_s7 + $0x70] sm:$0xff] %v3242_v15  ;;  %v3245_v47 = vadd.f32 %v3829_v3, %v5314_v34 }
 0x422   :  { %3263 = vst [vmem:[%s5387_s7 + $0x78] sm:$0xff] %v3245_v47 }
 0x423   :  { %3268 = vsyncpa [#allocation3], 1 }

</bundles_post_ra>
